<compile_context>
chip_gen: v6e
topology: v6e:2x2x1
jax: 0.10.0
libtpu: 0.0.40
codegen_flags: <defaults>
</compile_context>

<pallas_src>
import jax
import jax.numpy as jnp
from jax.experimental import pallas as pl
from jax.experimental.pallas import tpu as pltpu


def _round_up(x, m):
    return ((x + m - 1) // m) * m


def _hgnn_kernel(a_ref, x_ref, w1_ref, b1_ref, w2_ref, b2_ref,
                 o_ref, t1_ref, t2_ref):
    """Fused 2-layer HGNN forward, phase p = program_id(0), node tile i = program_id(1)."""
    p = pl.program_id(0)
    i = pl.program_id(1)
    mm = a_ref.dtype            # matmul operand dtype (bf16 or f32)

    @pl.when((p == 0) & (i == 0))
    def _init():
        t1_ref[...] = jnp.zeros_like(t1_ref)
        t2_ref[...] = jnp.zeros_like(t2_ref)

    @pl.when(p == 0)
    def _phase0():
        # y1 = X_i @ W1 + b1   (f32 epilogue)
        y1 = jnp.dot(x_ref[...], w1_ref[...],
                     preferred_element_type=jnp.float32) + b1_ref[...]
        # t1 += A_i^T @ y1, computed as (y1^T @ A_i)^T so only the 128-lane
        # f32 intermediates are transposed (never the incidence tile).
        r = jnp.dot(y1.T.astype(mm), a_ref[...],
                    preferred_element_type=jnp.float32)          # [Hid, E]
        t1_ref[...] += r.T
        o_ref[...] = jnp.zeros_like(o_ref)                       # keep flushes clean

    @pl.when(p == 1)
    def _phase1():
        # h1_i = relu(A_i @ t1)
        h1 = jnp.maximum(
            jnp.dot(a_ref[...], t1_ref[...].astype(mm),
                    preferred_element_type=jnp.float32), 0.0)    # [TN, Hid]
        # y2 = h1 @ W2 + b2
        y2 = jnp.dot(h1.astype(mm), w2_ref[...],
                     preferred_element_type=jnp.float32) + b2_ref[...]
        # t2 += A_i^T @ y2
        r = jnp.dot(y2.T.astype(mm), a_ref[...],
                    preferred_element_type=jnp.float32)          # [Fout, E]
        t2_ref[...] += r.T
        o_ref[...] = jnp.zeros_like(o_ref)

    @pl.when(p == 2)
    def _phase2():
        # OUT_i = A_i @ t2
        o_ref[...] = jnp.dot(a_ref[...], t2_ref[...].astype(mm),
                             preferred_element_type=jnp.float32).astype(o_ref.dtype)


def hgnn1_forward(H, X, W1, b1, W2, b2, *, use_bf16=True, node_tile=128):
    """HGNN1 forward.

    H:  [N, E] incidence matrix.
    X:  [N, Fin] node features.
    W1: [Fin, Hid], b1: [Hid]   (Linear stored as [in, out]).
    W2: [Hid, Fout], b2: [Fout].
    Returns [N, Fout] float32.
    """
    H = jnp.asarray(H, jnp.float32)
    X = jnp.asarray(X, jnp.float32)
    N, E = H.shape
    Fin = X.shape[1]
    Hid = W1.shape[1]
    Fout = W2.shape[1]
    assert X.shape == (N, Fin)
    assert W1.shape == (Fin, Hid) and W2.shape == (Hid, Fout)
    b1 = jnp.asarray(b1, jnp.float32).reshape(-1)
    b2 = jnp.asarray(b2, jnp.float32).reshape(-1)
    assert b1.size == Hid and b2.size == Fout

    # Fold both degree scalings into the incidence once (guarded against zero
    # degrees):  A = D_v^{-1/2} H D_e^{-1/2}   =>   L = A @ A^T.
    d_V = H.sum(axis=1)
    d_E = H.sum(axis=0)
    dv_is = jnp.where(d_V > 0, d_V ** -0.5, 0.0)
    de_is = jnp.where(d_E > 0, d_E ** -0.5, 0.0)
    A = (dv_is[:, None] * H) * de_is[None, :]

    # --- Pad to TPU-friendly (lane-dense, MXU-aligned) shapes ---------------
    TN = node_tile
    Np = _round_up(N, TN)
    Ep = _round_up(E, 128)
    Fin_p = _round_up(Fin, 128)
    Hid_p = _round_up(Hid, 128)      # exactly 128 for these sizes (keep small)
    Fout_p = _round_up(Fout, 128)
    n_tiles = Np // TN

    mm = jnp.bfloat16 if use_bf16 else jnp.float32

    A_p = jnp.zeros((Np, Ep), jnp.float32).at[:N, :E].set(A).astype(mm)
    X_p = jnp.zeros((Np, Fin_p), jnp.float32).at[:N, :Fin].set(X).astype(mm)
    W1_p = (jnp.zeros((Fin_p, Hid_p), jnp.float32)
            .at[:Fin, :Hid].set(jnp.asarray(W1, jnp.float32)).astype(mm))
    W2_p = (jnp.zeros((Hid_p, Fout_p), jnp.float32)
            .at[:Hid, :Fout].set(jnp.asarray(W2, jnp.float32)).astype(mm))
    b1_p = jnp.zeros((1, Hid_p), jnp.float32).at[0, :Hid].set(b1)
    b2_p = jnp.zeros((1, Fout_p), jnp.float32).at[0, :Fout].set(b2)

    # --- VMEM budget (double-buffered blocks + f32 edge scratch + headroom) --
    isz = jnp.dtype(mm).itemsize
    block_bytes = ((TN * Ep + TN * Fin_p + Fin_p * Hid_p + Hid_p * Fout_p) * isz
                   + (Hid_p + Fout_p) * 4 + TN * Fout_p * 4)
    scratch_bytes = (Ep * Hid_p + Ep * Fout_p) * 4
    vmem_limit = int(min(max(2 * block_bytes + scratch_bytes + (8 << 20),
                             32 << 20), 64 << 20))   # 64 MiB cap: safe on v7x

    # Advisory cost hint for the XLA scheduler (A is streamed 3x).
    flops = 2 * (Np * Fin_p * Hid_p          # X @ W1
                 + 2 * Np * Ep * Hid_p       # layer-1 propagate
                 + Np * Hid_p * Fout_p       # h @ W2
                 + 2 * Np * Ep * Fout_p)     # layer-2 propagate
    bytes_accessed = int(3 * A_p.nbytes + X_p.nbytes + W1_p.nbytes + W2_p.nbytes
                         + b1_p.nbytes + b2_p.nbytes + Np * Fout_p * 4)

    grid_spec = pltpu.PrefetchScalarGridSpec(
        num_scalar_prefetch=0,
        grid=(3, n_tiles),                                   # (phase, node tile)
        in_specs=[
            pl.BlockSpec((TN, Ep), lambda p, i: (i, 0)),         # A tile
            pl.BlockSpec((TN, Fin_p), lambda p, i: (i, 0)),      # X tile
            pl.BlockSpec((Fin_p, Hid_p), lambda p, i: (0, 0)),   # W1 (resident)
            pl.BlockSpec((1, Hid_p), lambda p, i: (0, 0)),       # b1
            pl.BlockSpec((Hid_p, Fout_p), lambda p, i: (0, 0)),  # W2
            pl.BlockSpec((1, Fout_p), lambda p, i: (0, 0)),      # b2
        ],
        out_specs=pl.BlockSpec((TN, Fout_p), lambda p, i: (i, 0)),
        scratch_shapes=[
            pltpu.VMEM((Ep, Hid_p), jnp.float32),   # t1 = A^T @ (X W1 + b1)
            pltpu.VMEM((Ep, Fout_p), jnp.float32),  # t2 = A^T @ (h W2 + b2)
        ],
    )

    out = pl.pallas_call(
        _hgnn_kernel,
        out_shape=jax.ShapeDtypeStruct((Np, Fout_p), jnp.float32),
        grid_spec=grid_spec,
        compiler_params=pltpu.CompilerParams(
            # Phases are strictly ordered and node tiles accumulate into shared
            # scratch -> both axes must stay sequential on a single core.
            dimension_semantics=("arbitrary", "arbitrary"),
            vmem_limit_bytes=vmem_limit),
        cost_estimate=pl.CostEstimate(flops=flops, transcendentals=0,
                                      bytes_accessed=bytes_accessed),
    )(A_p, X_p, W1_p, b1_p, W2_p, b2_p)

    return out[:N, :Fout]


def _reference(H, X, W1, b1, W2, b2):
    """Plain-JAX reference: dense Laplacian, two linear+propagate layers."""
    d_V = H.sum(axis=1)
    d_E = H.sum(axis=0)
    dv = jnp.where(d_V > 0, d_V ** -0.5, 0.0)
    de = jnp.where(d_E > 0, 1.0 / d_E, 0.0)
    M = (dv[:, None] * H) * de[None, :]
    L = (M @ H.T) * dv[None, :]
    h = jnp.maximum(L @ (X @ W1 + b1.reshape(1, -1)), 0.0)
    return L @ (h @ W2 + b2.reshape(1, -1))


if __name__ == "__main__":
    key = jax.random.PRNGKey(0)
    # Small but non-trivial: 2 node tiles of 128 (N=200 pads to 256), padded
    # edge/feature lanes, so the multi-tile reduction and padding paths run.
    N, E = 200, 96
    in_size, hidden, out_size = 32, 16, 8

    k_h, k_x, k_w1, k_b1, k_w2, k_b2 = jax.random.split(key, 6)

    # Random binary incidence; guarantee every node / edge has degree >= 1.
    H = (jax.random.uniform(k_h, (N, E)) < 0.25).astype(jnp.float32)
    H = H.at[jnp.arange(N), jnp.arange(N) % E].set(1.0)
    H = H.at[jnp.arange(E) % N, jnp.arange(E)].set(1.0)

    X = jax.random.normal(k_x, (N, in_size), dtype=jnp.float32)
    W1 = jax.random.normal(k_w1, (in_size, hidden), dtype=jnp.float32) * 0.1
    b1 = jax.random.normal(k_b1, (hidden,), dtype=jnp.float32) * 0.1
    W2 = jax.random.normal(k_w2, (hidden, out_size), dtype=jnp.float32) * 0.1
    b2 = jax.random.normal(k_b2, (out_size,), dtype=jnp.float32) * 0.1

    ref = _reference(H, X, W1, b1, W2, b2)

    # f32 path: near-exact vs. the dense-Laplacian reference.
    out_f32 = jax.block_until_ready(
        hgnn1_forward(H, X, W1, b1, W2, b2, use_bf16=False))
    assert out_f32.shape == (N, out_size)
    err_f32 = float(jnp.max(jnp.abs(out_f32 - ref)))
    assert jnp.allclose(out_f32, ref, atol=1e-4, rtol=1e-4), err_f32

    # Default bf16-MXU path (f32 accumulation / epilogue): looser tolerance.
    out_bf16 = jax.block_until_ready(hgnn1_forward(H, X, W1, b1, W2, b2))
    assert out_bf16.shape == (N, out_size)
    err_bf16 = float(jnp.max(jnp.abs(out_bf16 - ref)))
    assert err_bf16 < 5e-2, err_bf16

    print("KERNEL_OK")
</pallas_src>

<mosaic_0001>
module attributes {stable_mosaic.version = 11 : i64} {
  func.func @_hgnn_kernel(%arg0: i32, %arg1: i32, %arg2: memref<128x128xf32, #tpu.memory_space<vmem>>, %arg3: memref<128x128xf32, #tpu.memory_space<vmem>>, %arg4: memref<128x128xf32, #tpu.memory_space<vmem>>, %arg5: memref<1x128xf32, #tpu.memory_space<vmem>>, %arg6: memref<128x128xf32, #tpu.memory_space<vmem>>, %arg7: memref<1x128xf32, #tpu.memory_space<vmem>>, %arg8: memref<128x128xf32, #tpu.memory_space<vmem>>, %arg9: memref<128x128xf32, #tpu.memory_space<vmem>>, %arg10: memref<128x128xf32, #tpu.memory_space<vmem>>) attributes {dimension_semantics = [#tpu.dimension_semantics<arbitrary>, #tpu.dimension_semantics<arbitrary>], iteration_bounds = array<i64: 3, 2>, scalar_prefetch = 0 : i64, scratch_operands = 2 : i64, tpu.core_type = #tpu.core_type<tc>, window_params = [{transform_indices = @transform_0, window_bounds = array<i64: 128, 128>}, {transform_indices = @transform_1, window_bounds = array<i64: 128, 128>}, {pipeline_mode = #tpu.pipeline_mode<synchronous>, transform_indices = @transform_2, window_bounds = array<i64: 128, 128>}, {pipeline_mode = #tpu.pipeline_mode<synchronous>, transform_indices = @transform_3, window_bounds = array<i64: 1, 128>}, {pipeline_mode = #tpu.pipeline_mode<synchronous>, transform_indices = @transform_4, window_bounds = array<i64: 128, 128>}, {pipeline_mode = #tpu.pipeline_mode<synchronous>, transform_indices = @transform_5, window_bounds = array<i64: 1, 128>}, {transform_indices = @transform_6, window_bounds = array<i64: 128, 128>}]} {
    %c0_i32 = arith.constant 0 : i32
    %0 = arith.cmpi eq, %arg0, %c0_i32 : i32
    %c0_i32_0 = arith.constant 0 : i32
    %1 = arith.cmpi eq, %arg1, %c0_i32_0 : i32
    %2 = arith.andi %0, %1 : i1
    %3 = arith.extui %2 : i1 to i32
    %c0_i32_1 = arith.constant 0 : i32
    %4 = arith.cmpi ne, %3, %c0_i32_1 : i32
    scf.if %4 {
      %cst = arith.constant 0.000000e+00 : f32
      %14 = vector.broadcast %cst : f32 to vector<128x128xf32>
      %c0 = arith.constant 0 : index
      %c0_6 = arith.constant 0 : index
      %15 = vector.load %arg9[%c0, %c0_6] : memref<128x128xf32, #tpu.memory_space<vmem>>, vector<128x128xf32>
      tpu.vector_store %arg9[%c0, %c0_6], %14 {strides = array<i32>} : memref<128x128xf32, #tpu.memory_space<vmem>>, vector<128x128xf32>,
      %cst_7 = arith.constant 0.000000e+00 : f32
      %16 = vector.broadcast %cst_7 : f32 to vector<128x128xf32>
      %c0_8 = arith.constant 0 : index
      %c0_9 = arith.constant 0 : index
      %17 = vector.load %arg10[%c0_8, %c0_9] : memref<128x128xf32, #tpu.memory_space<vmem>>, vector<128x128xf32>
      tpu.vector_store %arg10[%c0_8, %c0_9], %16 {strides = array<i32>} : memref<128x128xf32, #tpu.memory_space<vmem>>, vector<128x128xf32>,
    } else {
    }
    %c0_i32_2 = arith.constant 0 : i32
    %5 = arith.cmpi eq, %arg0, %c0_i32_2 : i32
    %6 = arith.extui %5 : i1 to i32
    %c0_i32_3 = arith.constant 0 : i32
    %7 = arith.cmpi ne, %6, %c0_i32_3 : i32
    scf.if %7 {
      %c0 = arith.constant 0 : index
      %c0_6 = arith.constant 0 : index
      %14 = vector.load %arg3[%c0, %c0_6] : memref<128x128xf32, #tpu.memory_space<vmem>>, vector<128x128xf32>
      %c0_7 = arith.constant 0 : index
      %c0_8 = arith.constant 0 : index
      %15 = vector.load %arg4[%c0_7, %c0_8] : memref<128x128xf32, #tpu.memory_space<vmem>>, vector<128x128xf32>
      %cst = arith.constant dense<0.000000e+00> : vector<128x128xf32>
      %16 = tpu.matmul %14, %15, %cst {dimension_numbers = #tpu.dot_dimension_numbers<[1], [0], [0], [1], [0, 0, 1, 1], [], []>} : vector<128x128xf32>, vector<128x128xf32>, vector<128x128xf32> -> vector<128x128xf32>
      %c0_9 = arith.constant 0 : index
      %c0_10 = arith.constant 0 : index
      %17 = vector.load %arg5[%c0_9, %c0_10] : memref<1x128xf32, #tpu.memory_space<vmem>>, vector<1x128xf32>
      %18 = vector.broadcast %17 : vector<1x128xf32> to vector<128x128xf32>
      %19 = arith.addf %16, %18 : vector<128x128xf32>
      %20 = tpu.transpose %19, [1, 0] : vector<128x128xf32> -> vector<128x128xf32>
      %c0_11 = arith.constant 0 : index
      %c0_12 = arith.constant 0 : index
      %21 = vector.load %arg2[%c0_11, %c0_12] : memref<128x128xf32, #tpu.memory_space<vmem>>, vector<128x128xf32>
      %cst_13 = arith.constant dense<0.000000e+00> : vector<128x128xf32>
      %22 = tpu.matmul %20, %21, %cst_13 {dimension_numbers = #tpu.dot_dimension_numbers<[1], [0], [0], [1], [0, 0, 1, 1], [], []>} : vector<128x128xf32>, vector<128x128xf32>, vector<128x128xf32> -> vector<128x128xf32>
      %c0_14 = arith.constant 0 : index
      %c0_15 = arith.constant 0 : index
      %23 = vector.load %arg9[%c0_14, %c0_15] : memref<128x128xf32, #tpu.memory_space<vmem>>, vector<128x128xf32>
      %24 = tpu.transpose %22, [1, 0] : vector<128x128xf32> -> vector<128x128xf32>
      %25 = arith.addf %23, %24 : vector<128x128xf32>
      %c0_16 = arith.constant 0 : index
      %c0_17 = arith.constant 0 : index
      %26 = vector.load %arg9[%c0_16, %c0_17] : memref<128x128xf32, #tpu.memory_space<vmem>>, vector<128x128xf32>
      tpu.vector_store %arg9[%c0_16, %c0_17], %25 {strides = array<i32>} : memref<128x128xf32, #tpu.memory_space<vmem>>, vector<128x128xf32>,
      %cst_18 = arith.constant 0.000000e+00 : f32
      %27 = vector.broadcast %cst_18 : f32 to vector<128x128xf32>
      %c0_19 = arith.constant 0 : index
      %c0_20 = arith.constant 0 : index
      %28 = vector.load %arg8[%c0_19, %c0_20] : memref<128x128xf32, #tpu.memory_space<vmem>>, vector<128x128xf32>
      tpu.vector_store %arg8[%c0_19, %c0_20], %27 {strides = array<i32>} : memref<128x128xf32, #tpu.memory_space<vmem>>, vector<128x128xf32>,
    } else {
    }
    %c1_i32 = arith.constant 1 : i32
    %8 = arith.cmpi eq, %arg0, %c1_i32 : i32
    %9 = arith.extui %8 : i1 to i32
    %c0_i32_4 = arith.constant 0 : i32
    %10 = arith.cmpi ne, %9, %c0_i32_4 : i32
    scf.if %10 {
      %c0 = arith.constant 0 : index
      %c0_6 = arith.constant 0 : index
      %14 = vector.load %arg2[%c0, %c0_6] : memref<128x128xf32, #tpu.memory_space<vmem>>, vector<128x128xf32>
      %c0_7 = arith.constant 0 : index
      %c0_8 = arith.constant 0 : index
      %15 = vector.load %arg9[%c0_7, %c0_8] : memref<128x128xf32, #tpu.memory_space<vmem>>, vector<128x128xf32>
      %cst = arith.constant dense<0.000000e+00> : vector<128x128xf32>
      %16 = tpu.matmul %14, %15, %cst {dimension_numbers = #tpu.dot_dimension_numbers<[1], [0], [0], [1], [0, 0, 1, 1], [], []>} : vector<128x128xf32>, vector<128x128xf32>, vector<128x128xf32> -> vector<128x128xf32>
      %cst_9 = arith.constant 0.000000e+00 : f32
      %17 = vector.broadcast %cst_9 : f32 to vector<128x128xf32>
      %18 = arith.maximumf %16, %17 : vector<128x128xf32>
      %c0_10 = arith.constant 0 : index
      %c0_11 = arith.constant 0 : index
      %19 = vector.load %arg6[%c0_10, %c0_11] : memref<128x128xf32, #tpu.memory_space<vmem>>, vector<128x128xf32>
      %cst_12 = arith.constant dense<0.000000e+00> : vector<128x128xf32>
      %20 = tpu.matmul %18, %19, %cst_12 {dimension_numbers = #tpu.dot_dimension_numbers<[1], [0], [0], [1], [0, 0, 1, 1], [], []>} : vector<128x128xf32>, vector<128x128xf32>, vector<128x128xf32> -> vector<128x128xf32>
      %c0_13 = arith.constant 0 : index
      %c0_14 = arith.constant 0 : index
      %21 = vector.load %arg7[%c0_13, %c0_14] : memref<1x128xf32, #tpu.memory_space<vmem>>, vector<1x128xf32>
      %22 = vector.broadcast %21 : vector<1x128xf32> to vector<128x128xf32>
      %23 = arith.addf %20, %22 : vector<128x128xf32>
      %24 = tpu.transpose %23, [1, 0] : vector<128x128xf32> -> vector<128x128xf32>
      %c0_15 = arith.constant 0 : index
      %c0_16 = arith.constant 0 : index
      %25 = vector.load %arg2[%c0_15, %c0_16] : memref<128x128xf32, #tpu.memory_space<vmem>>, vector<128x128xf32>
      %cst_17 = arith.constant dense<0.000000e+00> : vector<128x128xf32>
      %26 = tpu.matmul %24, %25, %cst_17 {dimension_numbers = #tpu.dot_dimension_numbers<[1], [0], [0], [1], [0, 0, 1, 1], [], []>} : vector<128x128xf32>, vector<128x128xf32>, vector<128x128xf32> -> vector<128x128xf32>
      %c0_18 = arith.constant 0 : index
      %c0_19 = arith.constant 0 : index
      %27 = vector.load %arg10[%c0_18, %c0_19] : memref<128x128xf32, #tpu.memory_space<vmem>>, vector<128x128xf32>
      %28 = tpu.transpose %26, [1, 0] : vector<128x128xf32> -> vector<128x128xf32>
      %29 = arith.addf %27, %28 : vector<128x128xf32>
      %c0_20 = arith.constant 0 : index
      %c0_21 = arith.constant 0 : index
      %30 = vector.load %arg10[%c0_20, %c0_21] : memref<128x128xf32, #tpu.memory_space<vmem>>, vector<128x128xf32>
      tpu.vector_store %arg10[%c0_20, %c0_21], %29 {strides = array<i32>} : memref<128x128xf32, #tpu.memory_space<vmem>>, vector<128x128xf32>,
      %cst_22 = arith.constant 0.000000e+00 : f32
      %31 = vector.broadcast %cst_22 : f32 to vector<128x128xf32>
      %c0_23 = arith.constant 0 : index
      %c0_24 = arith.constant 0 : index
      %32 = vector.load %arg8[%c0_23, %c0_24] : memref<128x128xf32, #tpu.memory_space<vmem>>, vector<128x128xf32>
      tpu.vector_store %arg8[%c0_23, %c0_24], %31 {strides = array<i32>} : memref<128x128xf32, #tpu.memory_space<vmem>>, vector<128x128xf32>,
    } else {
    }
    %c2_i32 = arith.constant 2 : i32
    %11 = arith.cmpi eq, %arg0, %c2_i32 : i32
    %12 = arith.extui %11 : i1 to i32
    %c0_i32_5 = arith.constant 0 : i32
    %13 = arith.cmpi ne, %12, %c0_i32_5 : i32
    scf.if %13 {
      %c0 = arith.constant 0 : index
      %c0_6 = arith.constant 0 : index
      %14 = vector.load %arg2[%c0, %c0_6] : memref<128x128xf32, #tpu.memory_space<vmem>>, vector<128x128xf32>
      %c0_7 = arith.constant 0 : index
      %c0_8 = arith.constant 0 : index
      %15 = vector.load %arg10[%c0_7, %c0_8] : memref<128x128xf32, #tpu.memory_space<vmem>>, vector<128x128xf32>
      %cst = arith.constant dense<0.000000e+00> : vector<128x128xf32>
      %16 = tpu.matmul %14, %15, %cst {dimension_numbers = #tpu.dot_dimension_numbers<[1], [0], [0], [1], [0, 0, 1, 1], [], []>} : vector<128x128xf32>, vector<128x128xf32>, vector<128x128xf32> -> vector<128x128xf32>
      %c0_9 = arith.constant 0 : index
      %c0_10 = arith.constant 0 : index
      %17 = vector.load %arg8[%c0_9, %c0_10] : memref<128x128xf32, #tpu.memory_space<vmem>>, vector<128x128xf32>
      tpu.vector_store %arg8[%c0_9, %c0_10], %16 {strides = array<i32>} : memref<128x128xf32, #tpu.memory_space<vmem>>, vector<128x128xf32>,
    } else {
    }
    return
  }
  func.func @transform_0(%arg0: i32, %arg1: i32) -> (i32, i32) {
    %c0_i32 = arith.constant 0 : i32
    %c0_i32_0 = arith.constant 0 : i32
    return %arg1, %c0_i32 : i32, i32
  }
  func.func @transform_1(%arg0: i32, %arg1: i32) -> (i32, i32) {
    %c0_i32 = arith.constant 0 : i32
    %c0_i32_0 = arith.constant 0 : i32
    return %arg1, %c0_i32 : i32, i32
  }
  func.func @transform_2(%arg0: i32, %arg1: i32) -> (i32, i32) {
    %c0_i32 = arith.constant 0 : i32
    %c0_i32_0 = arith.constant 0 : i32
    %c0_i32_1 = arith.constant 0 : i32
    return %c0_i32, %c0_i32_0 : i32, i32
  }
  func.func @transform_3(%arg0: i32, %arg1: i32) -> (i32, i32) {
    %c0_i32 = arith.constant 0 : i32
    %c0_i32_0 = arith.constant 0 : i32
    %c0_i32_1 = arith.constant 0 : i32
    return %c0_i32, %c0_i32_0 : i32, i32
  }
  func.func @transform_4(%arg0: i32, %arg1: i32) -> (i32, i32) {
    %c0_i32 = arith.constant 0 : i32
    %c0_i32_0 = arith.constant 0 : i32
    %c0_i32_1 = arith.constant 0 : i32
    return %c0_i32, %c0_i32_0 : i32, i32
  }
  func.func @transform_5(%arg0: i32, %arg1: i32) -> (i32, i32) {
    %c0_i32 = arith.constant 0 : i32
    %c0_i32_0 = arith.constant 0 : i32
    %c0_i32_1 = arith.constant 0 : i32
    return %c0_i32, %c0_i32_0 : i32, i32
  }
  func.func @transform_6(%arg0: i32, %arg1: i32) -> (i32, i32) {
    %c0_i32 = arith.constant 0 : i32
    %c0_i32_0 = arith.constant 0 : i32
    return %arg1, %c0_i32 : i32, i32
  }
}

</mosaic_0001>

<bundles_post_ra>
// kernel: tpu_custom_call.1
= control target key start
LH: loop header
LB: loop body
LE: loop exit
PB: predicated region body
PF: predicated region fallthrough
CT: control target
= control target key end

     0   :  { %s3326_s0 = inlined_call_operand.hbm [shape: f32[256,128], index: 0, kind: input, shape index: {}]   ;;  %s3327_s1 = inlined_call_operand.hbm [shape: f32[256,128], index: 1, kind: input, shape index: {}]   ;;  %s3328_s2 = inlined_call_operand.hbm [shape: f32[128,128], index: 2, kind: input, shape index: {}]   ;;  %s3329_s3 = inlined_call_operand.vmem [shape: f32[1,128], index: 3, kind: input, shape index: {}]   ;;  %s3330_s4 = inlined_call_operand.hbm [shape: f32[128,128], index: 4, kind: input, shape index: {}]   ;;  %s3331_s5 = inlined_call_operand.vmem [shape: f32[1,128], index: 5, kind: input, shape index: {}]   ;;  %s3332_s6 = inlined_call_operand.hbm [shape: f32[256,128], index: 6, kind: output, shape index: {}]  }
   0x1   :  { %3340 = sst [smem:[#allocation22_spill]] %s3326_s0 }
   0x2   :  { %3341 = sst [smem:[#allocation23_spill]] %s3327_s1 }
   0x3   :  { %3342 = sst [smem:[#allocation24_spill]] %s3328_s2 }
   0x4   :  { %3343 = sst [smem:[#allocation25_spill]] %s3330_s4 }
   0x5   :  { %11 = vsyncpa [#allocation5], 0 }
   0x6   :  { %13 = vsyncpa [#allocation5 + $0x1], 0 }
   0x7   :  { %14 = vsyncpa [#allocation8], 0 }
   0x8   :  { %16 = vsyncpa [#allocation8 + $0x1], 0 }
   0x9   :  { %17 = vsyncpa [#allocation11], 0 }
   0xa   :  { %18 = vsyncpa [#allocation6], 0 }
   0xb   :  { %20 = vsyncpa [#allocation6 + $0x1], 0  ;;  %s2842_s21 = smov 0   ;;  %s2844_s22 = smov 0  }
   0xc   :  { %s2846_s23 = smov 0   ;;  %s2848_s24 = smov 0  }
   0xd   :  { %s2850_s25 = smov 0   ;;  %s2852_s26 = smov 0  }
   0xe   :  { %s2854_s27 = smov 0   ;;  %s2856_s28 = smov 0  }
   0xf LB: > { %3344 = sst [smem:[#allocation18_spill]] %s2785_s26  ;;  %s2883_s29 = sadd.s32 4294967295, %s2793_s28   ;;  %s2793_s28 = sphi %s2856_s28, %s26_s28   ;;  %s2789_s27 = sphi %s2854_s27, %s3364_s27   ;;  %s2785_s26 = sphi %s2852_s26, %s3363_s26   ;;  %s2781_s25 = sphi %s2850_s25, %s3362_s25   ;;  %s2777_s24 = sphi %s2848_s24, %s3361_s24   ;;  %s2773_s23 = sphi %s2846_s23, %s3367_s23   ;;  %s2769_s22 = sphi %s2844_s22, %s3366_s22   ;;  %s2765_s21 = sphi %s2842_s21, %s3365_s21  }
  0x10   : > { %3345 = sst [smem:[#allocation19_spill]] %s2789_s27  ;;  %s1844_s30 = sadd.s32 4294967294, %s2793_s28  }
  0x11   : > { %p58_p0 = scmp.ne.s32.totalorder %s2769_s22, %s2765_s21  ;;  %p59_p1 = scmp.eq.s32.totalorder %s2883_s29, 0 }
  0x12   : > { %p192_p2 = scmp.eq.s32.totalorder %s2883_s29, 5  ;;  %p198_p3 = scmp.eq.s32.totalorder %s1844_s30, 5 }
  0x13   : > { %p2892_p4 = por %p59_p1, %p58_p0  ;;  %p1845_p5 = scmp.ge.s32.totalorder %s2793_s28, 1 }
  0x14   : > { %p2897_p6 = por %p198_p3, %p58_p0  ;;  %p205_p7 = scmp.lt.s32.totalorder %s2793_s28, 7 }
  0x15   : > { %s2795_s10 = smov [#allocation9]   ;;  %s2796_s13 = smov [#allocation10]  }
  0x16   : > { %p2902_p8 = pnand %p1845_p5, %p205_p7  ;;  %s217_s11 = sshll.u32 %s2795_s10, 4  ;;  %s218_s11 = int_to_ptr.vmem [resolvable:$true] %s217_s11 }
  0x17   : > { %s233_s14 = sshll.u32 %s2796_s13, 4  ;;  %s2588_s15 = scalar_lea.vmem %s218_s11, 2048  ;;  %s234_s14 = int_to_ptr.vmem [resolvable:$true] %s233_s14 }
  0x18   : > { %p2480_p9 = pneg %p2902_p8  ;;  %p2589_p12 = scmp.ne.s32.totalorder %s218_s11, %s2588_s15 }
  0x19   : > { %p2596_p3 = scmp.lt.s32.totalorder %s218_s11, %s218_s11  ;;  %p2597_p5 = scmp.lt.s32.totalorder %s2588_s15, %s2588_s15 }
  0x1a   : > { %p2910_p10 = pnand %p2480_p9, %p59_p1 }
  0x1b   : > { %p2598_p7 = por %p2597_p5, %p2596_p3 }
  0x1c   : > { %p2579_p11 = pneg %p2910_p10 }
  0x1e   : > { %p2591_p13 = pnand %p2589_p12, %p2579_p11 }
  0x20   : > { %p2592_p0 = pneg %p2591_p13 }
  0x22   : > { %p2599_p9 = pnand %p2598_p7, %p2592_p0 }
  0x24   : > { %2602 = shalt.err (!%p2599_p9)
}
  0x25   : > { %s3333_s16 = smov 128   ;;  %s3335_s17 = smov 8  }
  0x26   : > { %s3350_s2 = sld [smem:[#allocation24_spill]]  ;;  %s2614_s20 = scalar_lea.vmem %s234_s14, 2048 }
  0x27   : > { %p2615_p12 = scmp.ne.s32.totalorder %s234_s14, %s2614_s20  ;;  %p2622_p0 = scmp.lt.s32.totalorder %s234_s14, %s234_s14 }
  0x28   : > { %p2623_p5 = scmp.lt.s32.totalorder %s2614_s20, %s2614_s20 }
  0x29   : > { %p2617_p13 = pnand %p2615_p12, %p2579_p11 }
  0x2a   : > { %p2624_p7 = por %p2623_p5, %p2622_p0 }
  0x2b   : > { %p2618_p3 = pneg %p2617_p13 }
  0x2c   : > { %2483 = dma.hbm_to_vmem [thread:$0]  (!%p2910_p10), %s3350_s2, 2048, %s218_s11, [#allocation8], %s3333_s16, %s3333_s16, %s3335_s17  }
  0x2d   : > { %p2625_p9 = pnand %p2624_p7, %p2618_p3 }
  0x2f   : > { %2628 = shalt.err (!%p2625_p9)
}
  0x30   : > { %s3351_s4 = sld [smem:[#allocation25_spill]]  ;;  %s35_s11 = sadd.s32 1, %s2785_s26 }
  0x31   : > { %s38_s12 = sadd.s32 1, %s2789_s27  ;;  %p36_p11 = scmp.ge.s32.totalorder %s35_s11, 2 }
  0x32   : > { %s45_s13 = sadd.s32 1, %s2773_s23  ;;  %p52_p12 = scmp.ne.s32.totalorder %s2773_s23, %s2769_s22 }
  0x33   : > { %p53_p13 = scmp.eq.s32.totalorder %s2793_s28, 0  ;;  %s3369_s11 = smov (%p36_p11, %s35_s11), 0 }
  0x34   : > { %3352 = sst [smem:[#allocation20_spill]] %s3369_s11  ;;  %s3371_s12 = smov (!%p36_p11, %s38_s12), %s2789_s27 }
  0x35   : > { %s42_s15 = ssub.s32 %s2785_s26, %s3369_s11  ;;  %p2949_p3 = por %p53_p13, %p52_p12 }
  0x36   : > { %2486 = dma.hbm_to_vmem [thread:$0]  (!%p2910_p10), %s3351_s4, 2048, %s234_s14, [#allocation11], %s3333_s16, %s3333_s16, %s3335_s17  }
  0x37   : > { %p40_p10 = scmp.ge.s32.totalorder %s3371_s12, 3  ;;  %p43_p0 = scmp.eq.s32.totalorder %s42_s15, 0 }
  0x38   : > { %p2955_p5 = por %p192_p2, %p52_p12  ;;  %p2500_p7 = scmp.lt.s32.totalorder %s2793_s28, 6 }
  0x39   : > { %s3373_s12 = smov (%p40_p10, %s3371_s12), 0  ;;  %s250_s20 = sand.u32 1, %s2773_s23  }
  0x3a   : > { %3355 = sst [smem:[#allocation21_spill]] %s3373_s12  ;;  %s1871_s30 = sshll.u32 %s2785_s26, 11 }
  0x3b   : > { %s2963_s19 = scalar_select %p43_p0, %s2773_s23, %s45_s13  }
  0x3c   : > { %s1849_s10 = sshll.u32 %s250_s20, 7  ;;  %s3356_s0 = sld [smem:[#allocation22_spill]] }
  0x3d   : > { %s254_s4 = scalar_lea.vmem [#allocation4], %s1849_s10  ;;  %p2972_p9 = pnand %p2500_p7, %p2949_p3 }
  0x3e   : > { %s261_s11 = sshll.u32 %s254_s4, 4  ;;  %s3358_s1 = sld [smem:[#allocation23_spill]]  ;;  %s262_s11 = int_to_ptr.vmem [resolvable:$true] %s261_s11 }
  0x3f   : > { %s251_s26 = scalar_lea.sflag [#allocation5], %s250_s20  ;;  %p2631_p2 = pneg %p2972_p9 }
  0x40   : > { %s2642_s16 = scalar_lea.vmem %s262_s11, 2048  ;;  %s2799_s4 = smov [#allocation4]  }
  0x41   : > { %p2643_p11 = scmp.ne.s32.totalorder %s262_s11, %s2642_s16  ;;  %s2647_s17 = sshll.u32 %s2799_s4, 4  ;;  %s2648_s17 = int_to_ptr.vmem [resolvable:$false] %s2647_s17 }
  0x42   : > { %s260_s2 = scalar_lea.hbm %s3356_s0, %s1871_s30  ;;  %s2649_s18 = scalar_lea.vmem %s2648_s17, 4096 }
  0x43   : > { %p2645_p12 = pnand %p2643_p11, %p2631_p2  ;;  %p2650_p3 = scmp.lt.s32.totalorder %s262_s11, %s2648_s17 }
  0x44   : > { %s2979_s27 = scalar_lea.hbm %s3358_s1, %s1871_s30  ;;  %p2651_p10 = scmp.lt.s32.totalorder %s2649_s18, %s2642_s16 }
  0x45   : > { %p2646_p13 = pneg %p2645_p12 }
  0x46   : > { %p2652_p0 = por %p2651_p10, %p2650_p3 }
  0x48   : > { %p2653_p7 = pnand %p2652_p0, %p2646_p13 }
  0x4a   : > { %2656 = shalt.err (!%p2653_p7)
}
  0x4b   : > { %s3359_s12 = smov 8   ;;  %s3360_s20 = smov 128  }
  0x4c   : > { %2490 = dma.hbm_to_vmem [thread:$0]  (!%p2972_p9), %s260_s2, 2048, %s262_s11, %s251_s26, %s3360_s20, %s3360_s20, %s3359_s12  }
  0x4d   : > { %s275_s30 = scalar_lea.vmem [#allocation7], %s1849_s10  ;;  %s271_s0 = sand.u32 1, %s2793_s28  }
  0x4e   : > { %s282_s13 = sshll.u32 %s275_s30, 4  ;;  %s272_s4 = scalar_lea.sflag [#allocation8], %s271_s0  ;;  %s283_s13 = int_to_ptr.vmem [resolvable:$true] %s282_s13 }
  0x4f   : > { %s2670_s1 = scalar_lea.vmem %s283_s13, 2048  ;;  %s2800_s16 = smov [#allocation7]  }
  0x50   : > { %p2671_p11 = scmp.ne.s32.totalorder %s283_s13, %s2670_s1  ;;  %s2675_s17 = sshll.u32 %s2800_s16, 4  ;;  %s2676_s17 = int_to_ptr.vmem [resolvable:$false] %s2675_s17 }
  0x51   : > { %s2677_s18 = scalar_lea.vmem %s2676_s17, 4096  ;;  %p2678_p3 = scmp.lt.s32.totalorder %s283_s13, %s2676_s17 }
  0x52   : > { %p2673_p12 = pnand %p2671_p11, %p2631_p2  ;;  %p2679_p10 = scmp.lt.s32.totalorder %s2677_s18, %s2670_s1 }
  0x54   : > { %p2674_p13 = pneg %p2673_p12  ;;  %p2680_p0 = por %p2679_p10, %p2678_p3 }
  0x56   : > { %p2681_p7 = pnand %p2680_p0, %p2674_p13 }
  0x58   : > { %2684 = shalt.err (!%p2681_p7)
}
  0x59   : > { %2493 = dma.hbm_to_vmem [thread:$0]  (!%p2972_p9), %s2979_s27, 2048, %s283_s13, %s272_s4, %s3360_s20, %s3360_s20, %s3359_s12  }
  0x5a   : > { %294 = sbr.rel (%p2902_p8) target bundleno = 2098 (0x832), region = 44  ;;  %s3004_s0 = sand.u32 (!%p2902_p8), 1, %s2769_s22  }
  0x5b   : > { %s1856_s1 = sshll.u32 (!%p2902_p8), %s3004_s0, 7  ;;  %s297_s2 = scalar_lea.sflag (!%p2902_p8), [#allocation5], %s3004_s0 }
  0x5c   : > { %s3008_s26 = scalar_lea.vmem (!%p2902_p8), [#allocation4], %s1856_s1 }
  0x5f   : > { %2744 = dma.done.wait (%p2892_p4), %s297_s2, 2048  }
  0x60   : > { %2746 = vsyncadd (%p2892_p4), %s297_s2, 4294965248  ;;  %s305_s27 = sand.u32 1, %s2883_s29   ;;  %s3015_s11 = scalar_lea.vmem [#allocation7], %s1856_s1 }
  0x61   : > { %s306_s9 = scalar_lea.sflag [#allocation8], %s305_s27 }
  0x62   : > { %2748 = dma.done.wait (%p2892_p4), %s306_s9, 2048  }
  0x63   : > { %2750 = vsyncadd (%p2892_p4), %s306_s9, 4294965248 }
  0x64   : > { %2752 = dma.done.wait (%p59_p1), [#allocation8], 2048  }
  0x65   : > { %2754 = vsyncadd (%p59_p1), [#allocation8], 4294965248 }
  0x66   : > { %2756 = dma.done.wait (%p59_p1), [#allocation11], 2048  }
  0x67   : > { %2758 = vsyncadd (%p59_p1), [#allocation11], 4294965248  ;;  %p354_p8 = scmp.eq.s32.totalorder %s2781_s25, 0  ;;  %p355_p9 = scmp.eq.s32.totalorder %s2777_s24, 0 }
  0x68   : > { %s3031_s10 = scalar_lea.vmem [#allocation12], %s1856_s1 }
  0x69   : > { %p356_p2 = pnand %p355_p9, %p354_p8 }
  0x6b   : > { %359 = sbr.rel (%p356_p2) target bundleno = 129 (0x81), region = 64 }
  0x70   : > { %v2801_v0 = vmov 0.0  }
  0x71   : > { %360 = vst [vmem:[#allocation2 + $0x30] sm:$0xff] %v2801_v0  ;;  %361 = vst [vmem:[#allocation2] sm:$0xff] %v2801_v0 }
  0x72   : > { %362 = vst [vmem:[#allocation2 + $0x58] sm:$0xff] %v2801_v0  ;;  %363 = vst [vmem:[#allocation2 + $0x18] sm:$0xff] %v2801_v0 }
  0x73   : > { %364 = vst [vmem:[#allocation2 + $0x50] sm:$0xff] %v2801_v0  ;;  %365 = vst [vmem:[#allocation2 + $0x68] sm:$0xff] %v2801_v0 }
  0x74   : > { %366 = vst [vmem:[#allocation2 + $0x8] sm:$0xff] %v2801_v0  ;;  %367 = vst [vmem:[#allocation2 + $0x48] sm:$0xff] %v2801_v0 }
  0x75   : > { %368 = vst [vmem:[#allocation2 + $0x40] sm:$0xff] %v2801_v0  ;;  %369 = vst [vmem:[#allocation2 + $0x20] sm:$0xff] %v2801_v0 }
  0x76   : > { %370 = vst [vmem:[#allocation2 + $0x10] sm:$0xff] %v2801_v0  ;;  %371 = vst [vmem:[#allocation2 + $0x38] sm:$0xff] %v2801_v0 }
  0x77   : > { %372 = vst [vmem:[#allocation2 + $0x60] sm:$0xff] %v2801_v0  ;;  %373 = vst [vmem:[#allocation2 + $0x70] sm:$0xff] %v2801_v0 }
  0x78   : > { %374 = vst [vmem:[#allocation2 + $0x78] sm:$0xff] %v2801_v0  ;;  %375 = vst [vmem:[#allocation2 + $0x28] sm:$0xff] %v2801_v0 }
  0x79   : > { %376 = vst [vmem:[#allocation3 + $0x28] sm:$0xff] %v2801_v0  ;;  %377 = vst [vmem:[#allocation3 + $0x68] sm:$0xff] %v2801_v0 }
  0x7a   : > { %378 = vst [vmem:[#allocation3 + $0x10] sm:$0xff] %v2801_v0  ;;  %379 = vst [vmem:[#allocation3 + $0x40] sm:$0xff] %v2801_v0 }
  0x7b   : > { %380 = vst [vmem:[#allocation3 + $0x48] sm:$0xff] %v2801_v0  ;;  %381 = vst [vmem:[#allocation3 + $0x30] sm:$0xff] %v2801_v0 }
  0x7c   : > { %382 = vst [vmem:[#allocation3 + $0x70] sm:$0xff] %v2801_v0  ;;  %383 = vst [vmem:[#allocation3 + $0x38] sm:$0xff] %v2801_v0 }
  0x7d   : > { %384 = vst [vmem:[#allocation3 + $0x20] sm:$0xff] %v2801_v0  ;;  %385 = vst [vmem:[#allocation3 + $0x78] sm:$0xff] %v2801_v0 }
  0x7e   : > { %386 = vst [vmem:[#allocation3 + $0x18] sm:$0xff] %v2801_v0  ;;  %387 = vst [vmem:[#allocation3 + $0x58] sm:$0xff] %v2801_v0 }
  0x7f   : > { %388 = vst [vmem:[#allocation3] sm:$0xff] %v2801_v0  ;;  %389 = vst [vmem:[#allocation3 + $0x8] sm:$0xff] %v2801_v0 }
  0x80   : > { %390 = vst [vmem:[#allocation3 + $0x60] sm:$0xff] %v2801_v0  ;;  %391 = vst [vmem:[#allocation3 + $0x50] sm:$0xff] %v2801_v0 }
  0x81 PF: > { %p1861_p1 = scmp.ne.s32.totalorder %s2781_s25, 0 }
  0x83   : > { %394 = sbr.rel (%p1861_p1) target bundleno = 878 (0x36e), region = 68 }
  0x88   : > { %v426_v1 = vld [vmem:[#allocation9 + $0x78] sm:$0xff]  ;;  %v425_v2 = vld [vmem:[#allocation9 + $0x70] sm:$0xff]  ;;  %v424_v3 = vld [vmem:[#allocation9 + $0x68] sm:$0xff] }
  0x89   : > { %2066 = vmatprep.subr.mxu0 %v426_v1  ;;  %v423_v4 = vld [vmem:[#allocation9 + $0x60] sm:$0xff]  ;;  %v422_v6 = vld [vmem:[#allocation9 + $0x58] sm:$0xff]  ;;  %v421_v7 = vld [vmem:[#allocation9 + $0x50] sm:$0xff] }
  0x8a   : > { %2067 = vmatpush3.msra.mxu0 %v426_v1  ;;  %v395_v5 = vld [vmem:[%s3015_s11] sm:$0xff]  ;;  %v420_v8 = vld [vmem:[#allocation9 + $0x48] sm:$0xff]  ;;  %v418_v10 = vld [vmem:[#allocation9 + $0x38] sm:$0xff] }
  0x8b   : > { %2068 = vmatprep.subr.mxu0 %v425_v2  ;;  %2098 = vmatprep.mubr.f32.mxu0 %v395_v5  ;;  %v419_v9 = vld [vmem:[#allocation9 + $0x40] sm:$0xff]  ;;  %v417_v11 = vld [vmem:[#allocation9 + $0x30] sm:$0xff]  ;;  %v416_v12 = vld [vmem:[#allocation9 + $0x28] sm:$0xff] }
  0x8c   : > { %2069 = vmatpush3.msra.mxu0 %v425_v2  ;;  %v415_v13 = vld [vmem:[#allocation9 + $0x20] sm:$0xff]  ;;  %v414_v14 = vld [vmem:[#allocation9 + $0x18] sm:$0xff]  ;;  %v413_v15 = vld [vmem:[#allocation9 + $0x10] sm:$0xff] }
  0x8d   : > { %2070 = vmatprep.subr.mxu0 %v424_v3  ;;  %v412_v16 = vld [vmem:[#allocation9 + $0x8] sm:$0xff]  ;;  %v411_v17 = vld [vmem:[#allocation9] sm:$0xff]  ;;  %v397_v19 = vld [vmem:[%s3015_s11 + $0x10] sm:$0xff] }
  0x8e   : > { %2071 = vmatpush3.msra.mxu0 %v424_v3  ;;  %v396_v18 = vld [vmem:[%s3015_s11 + $0x8] sm:$0xff]  ;;  %v398_v20 = vld [vmem:[%s3015_s11 + $0x18] sm:$0xff]  ;;  %v399_v21 = vld [vmem:[%s3015_s11 + $0x20] sm:$0xff] }
  0x8f   : > { %2072 = vmatprep.subr.mxu0 %v423_v4  ;;  %v400_v22 = vld [vmem:[%s3015_s11 + $0x28] sm:$0xff]  ;;  %v401_v23 = vld [vmem:[%s3015_s11 + $0x30] sm:$0xff]  ;;  %v402_v24 = vld [vmem:[%s3015_s11 + $0x38] sm:$0xff] }
  0x90   : > { %2073 = vmatpush3.msra.mxu0 %v423_v4  ;;  %v403_v25 = vld [vmem:[%s3015_s11 + $0x40] sm:$0xff]  ;;  %v404_v26 = vld [vmem:[%s3015_s11 + $0x48] sm:$0xff]  ;;  %v405_v27 = vld [vmem:[%s3015_s11 + $0x50] sm:$0xff] }
  0x91   : > { %2074 = vmatprep.subr.mxu0 %v422_v6  ;;  %v406_v28 = vld [vmem:[%s3015_s11 + $0x58] sm:$0xff]  ;;  %v407_v29 = vld [vmem:[%s3015_s11 + $0x60] sm:$0xff]  ;;  %v408_v30 = vld [vmem:[%s3015_s11 + $0x68] sm:$0xff] }
  0x92   : > { %2075 = vmatpush3.msra.mxu0 %v422_v6  ;;  %v409_v31 = vld [vmem:[%s3015_s11 + $0x70] sm:$0xff]  ;;  %v410_v32 = vld [vmem:[%s3015_s11 + $0x78] sm:$0xff]  ;;  %v624_v35 = vld [vmem:[%s3008_s26 + $0x68] sm:$0xff] }
  0x93   : > { %2076 = vmatprep.subr.mxu0 %v421_v7  ;;  %v626_v33 = vld [vmem:[%s3008_s26 + $0x78] sm:$0xff]  ;;  %v625_v34 = vld [vmem:[%s3008_s26 + $0x70] sm:$0xff]  ;;  %v623_v36 = vld [vmem:[%s3008_s26 + $0x60] sm:$0xff] }
  0x94   : > { %2077 = vmatpush3.msra.mxu0 %v421_v7  ;;  %2122 = vmatprep.subr.mxu1 %v626_v33  ;;  %v622_v37 = vld [vmem:[%s3008_s26 + $0x58] sm:$0xff]  ;;  %v621_v38 = vld [vmem:[%s3008_s26 + $0x50] sm:$0xff]  ;;  %v620_v39 = vld [vmem:[%s3008_s26 + $0x48] sm:$0xff] }
  0x95   : > { %2078 = vmatprep.subr.mxu0 %v420_v8  ;;  %2123 = vmatpush3.msra.mxu1 %v626_v33  ;;  %v619_v40 = vld [vmem:[%s3008_s26 + $0x40] sm:$0xff]  ;;  %v618_v41 = vld [vmem:[%s3008_s26 + $0x38] sm:$0xff]  ;;  %v617_v42 = vld [vmem:[%s3008_s26 + $0x30] sm:$0xff] }
  0x96   : > { %2079 = vmatpush3.msra.mxu0 %v420_v8  ;;  %2124 = vmatprep.subr.mxu1 %v625_v34  ;;  %v616_v43 = vld [vmem:[%s3008_s26 + $0x28] sm:$0xff]  ;;  %v615_v44 = vld [vmem:[%s3008_s26 + $0x20] sm:$0xff]  ;;  %v614_v45 = vld [vmem:[%s3008_s26 + $0x18] sm:$0xff] }
  0x97   : > { %2080 = vmatprep.subr.mxu0 %v419_v9  ;;  %2125 = vmatpush3.msra.mxu1 %v625_v34  ;;  %v613_v46 = vld [vmem:[%s3008_s26 + $0x10] sm:$0xff]  ;;  %v612_v48 = vld [vmem:[%s3008_s26 + $0x8] sm:$0xff]  ;;  %v1862_v49 = vld [vmem:[%s3329_s3] ss:$0 sm:$0xff] }
  0x98   : > { %2081 = vmatpush3.msra.mxu0 %v419_v9  ;;  %2126 = vmatprep.subr.mxu1 %v624_v35  ;;  %v611_v51 = vld [vmem:[%s3008_s26] sm:$0xff] }
  0x99   : > { %2082 = vmatprep.subr.mxu0 %v418_v10  ;;  %2127 = vmatpush3.msra.mxu1 %v624_v35 }
  0x9a   : > { %2083 = vmatpush3.msra.mxu0 %v418_v10  ;;  %2128 = vmatprep.subr.mxu1 %v623_v36 }
  0x9b   : > { %2084 = vmatprep.subr.mxu0 %v417_v11  ;;  %2129 = vmatpush3.msra.mxu1 %v623_v36 }
  0x9c   : > { %2085 = vmatpush3.msra.mxu0 %v417_v11  ;;  %2130 = vmatprep.subr.mxu1 %v622_v37 }
  0x9d   : > { %2086 = vmatprep.subr.mxu0 %v416_v12  ;;  %2131 = vmatpush3.msra.mxu1 %v622_v37 }
  0x9e   : > { %2087 = vmatpush3.msra.mxu0 %v416_v12  ;;  %2132 = vmatprep.subr.mxu1 %v621_v38 }
  0x9f   : > { %2088 = vmatprep.subr.mxu0 %v415_v13  ;;  %2133 = vmatpush3.msra.mxu1 %v621_v38 }
  0xa0   : > { %2089 = vmatpush3.msra.mxu0 %v415_v13  ;;  %2134 = vmatprep.subr.mxu1 %v620_v39 }
  0xa1   : > { %2090 = vmatprep.subr.mxu0 %v414_v14  ;;  %2135 = vmatpush3.msra.mxu1 %v620_v39 }
  0xa2   : > { %2091 = vmatpush3.msra.mxu0 %v414_v14  ;;  %2136 = vmatprep.subr.mxu1 %v619_v40 }
  0xa3   : > { %2092 = vmatprep.subr.mxu0 %v413_v15  ;;  %2137 = vmatpush3.msra.mxu1 %v619_v40 }
  0xa4   : > { %2093 = vmatpush3.msra.mxu0 %v413_v15  ;;  %2138 = vmatprep.subr.mxu1 %v618_v41 }
  0xa5   : > { %2094 = vmatprep.subr.mxu0 %v412_v16  ;;  %2139 = vmatpush3.msra.mxu1 %v618_v41 }
  0xa6   : > { %2095 = vmatpush3.msra.mxu0 %v412_v16  ;;  %2140 = vmatprep.subr.mxu1 %v617_v42 }
  0xa7   : > { %2096 = vmatprep.subr.mxu0 %v411_v17  ;;  %2141 = vmatpush3.msra.mxu1 %v617_v42 }
  0xa8   : > { %2097 = vmatpush3.msra.mxu0 %v411_v17  ;;  %2142 = vmatprep.subr.mxu1 %v616_v43 }
  0xa9   : > { %2099 = vmatmul.mubr.f32.vlgmr.msra.gmra.mxu0 %v396_v18  ;;  %2143 = vmatpush3.msra.mxu1 %v616_v43 }
  0xaa   : > { %2101 = vmatprep.mubr.f32.mxu0 %v397_v19  ;;  %2144 = vmatprep.subr.mxu1 %v615_v44 }
  0xab   : > { %2145 = vmatpush3.msra.mxu1 %v615_v44 }
  0xac   : > { %2146 = vmatprep.subr.mxu1 %v614_v45 }
  0xad   : > { %2102 = vmatmul.mubr.f32.gmra.mxu0 %v398_v20  ;;  %2147 = vmatpush3.msra.mxu1 %v614_v45 }
  0xae   : > { %2104 = vmatprep.mubr.f32.mxu0 %v399_v21  ;;  %2148 = vmatprep.subr.mxu1 %v613_v46 }
  0xaf   : > { %2149 = vmatpush3.msra.mxu1 %v613_v46 }
  0xb0   : > { %2150 = vmatprep.subr.mxu1 %v612_v48 }
  0xb1   : > { %2105 = vmatmul.mubr.f32.gmra.mxu0 %v400_v22  ;;  %2151 = vmatpush3.msra.mxu1 %v612_v48 }
  0xb2   : > { %2107 = vmatprep.mubr.f32.mxu0 %v401_v23  ;;  %2152 = vmatprep.subr.mxu1 %v611_v51 }
  0xb3   : > { %2153 = vmatpush3.msra.mxu1 %v611_v51  ;;  %v772_v51 = vld [vmem:[#allocation2 + $0x30] sm:$0xff] }
  0xb5   : > { %2108 = vmatmul.mubr.f32.gmra.mxu0 %v402_v24 }
  0xb6   : > { %2110 = vmatprep.mubr.f32.mxu0 %v403_v25 }
  0xb9   : > { %2111 = vmatmul.mubr.f32.gmra.mxu0 %v404_v26 }
  0xba   : > { %2113 = vmatprep.mubr.f32.mxu0 %v405_v27 }
  0xbd   : > { %2114 = vmatmul.mubr.f32.gmra.mxu0 %v406_v28 }
  0xbe   : > { %2116 = vmatprep.mubr.f32.mxu0 %v407_v29 }
  0xc1   : > { %2117 = vmatmul.mubr.f32.gmra.mxu0 %v408_v30 }
  0xc2   : > { %2119 = vmatprep.mubr.f32.mxu0 %v409_v31 }
  0xc5   : > { %2120 = vmatmul.mubr.f32.gmra.mxu0 %v410_v32 }
 0x169   : > { %v2100_v47 = vpop.f32.mrf.mxu0 }
 0x16a   : > { %v506_v54 = vadd.f32 %v2100_v47, %v1862_v49 }
 0x16b   : > { %v500_v50 = vpop.f32.mrf.mxu0 }
 0x16c   : > { %v501_v52 = vadd.f32 %v1862_v49, %v500_v50  ;;  %v2802_v50 = vmov 0.0  }
 0x16d   : > { %v2103_v53 = vpop.f32.mrf.mxu0  ;;  %852 = vst [vmem:[%s3031_s10] sm:$0xff] %v2802_v50  ;;  %853 = vst [vmem:[%s3031_s10 + $0x8] sm:$0xff] %v2802_v50 }
 0x16e   : > { %579 = vxpose.xlu0.b32.start [1/16] %v501_v52, 128  ;;  %v516_v58 = vadd.f32 %v2103_v53, %v1862_v49  ;;  %854 = vst [vmem:[%s3031_s10 + $0x10] sm:$0xff] %v2802_v50  ;;  %855 = vst [vmem:[%s3031_s10 + $0x18] sm:$0xff] %v2802_v50 }
 0x16f   : > { %v510_v55 = vpop.f32.mrf.mxu0  ;;  %856 = vst [vmem:[%s3031_s10 + $0x20] sm:$0xff] %v2802_v50  ;;  %857 = vst [vmem:[%s3031_s10 + $0x28] sm:$0xff] %v2802_v50 }
 0x170   : > { %v511_v56 = vadd.f32 %v1862_v49, %v510_v55  ;;  %858 = vst [vmem:[%s3031_s10 + $0x30] sm:$0xff] %v2802_v50  ;;  %859 = vst [vmem:[%s3031_s10 + $0x38] sm:$0xff] %v2802_v50 }
 0x171   : > { %v2106_v57 = vpop.f32.mrf.mxu0  ;;  %860 = vst [vmem:[%s3031_s10 + $0x40] sm:$0xff] %v2802_v50  ;;  %861 = vst [vmem:[%s3031_s10 + $0x48] sm:$0xff] %v2802_v50 }
 0x172   : > { %580 = vxpose.xlu0.b32.cont [2/16] %v506_v54, 128  ;;  %v526_v62 = vadd.f32 %v2106_v57, %v1862_v49  ;;  %862 = vst [vmem:[%s3031_s10 + $0x50] sm:$0xff] %v2802_v50  ;;  %863 = vst [vmem:[%s3031_s10 + $0x58] sm:$0xff] %v2802_v50  ;;  %v773_v54 = vld [vmem:[#allocation2] sm:$0xff]  ;;  %v774_v57 = vld [vmem:[#allocation2 + $0x58] sm:$0xff] }
 0x173   : > { %v520_v59 = vpop.f32.mrf.mxu0  ;;  %864 = vst [vmem:[%s3031_s10 + $0x60] sm:$0xff] %v2802_v50  ;;  %865 = vst [vmem:[%s3031_s10 + $0x68] sm:$0xff] %v2802_v50 }
 0x174   : > { %v521_v60 = vadd.f32 %v1862_v49, %v520_v59  ;;  %866 = vst [vmem:[%s3031_s10 + $0x70] sm:$0xff] %v2802_v50  ;;  %867 = vst [vmem:[%s3031_s10 + $0x78] sm:$0xff] %v2802_v50 }
 0x175   : > { %v2109_v61 = vpop.f32.mrf.mxu0 }
 0x176   : > { %581 = vxpose.xlu0.b32.cont [3/16] %v511_v56, 128  ;;  %v536_v2 = vadd.f32 %v2109_v61, %v1862_v49 }
 0x177   : > { %v530_v63 = vpop.f32.mrf.mxu0 }
 0x178   : > { %v531_v0 = vadd.f32 %v1862_v49, %v530_v63  ;;  %v776_v63 = vld [vmem:[#allocation2 + $0x50] sm:$0xff] }
 0x179   : > { %v2112_v1 = vpop.f32.mrf.mxu0 }
 0x17a   : > { %582 = vxpose.xlu0.b32.cont [4/16] %v516_v58, 128  ;;  %v546_v6 = vadd.f32 %v2112_v1, %v1862_v49 }
 0x17b   : > { %v540_v3 = vpop.f32.mrf.mxu0 }
 0x17c   : > { %v541_v4 = vadd.f32 %v1862_v49, %v540_v3 }
 0x17d   : > { %v2115_v5 = vpop.f32.mrf.mxu0 }
 0x17e   : > { %583 = vxpose.xlu0.b32.cont [5/16] %v521_v60, 128  ;;  %v556_v10 = vadd.f32 %v2115_v5, %v1862_v49  ;;  %v775_v60 = vld [vmem:[#allocation2 + $0x18] sm:$0xff]  ;;  %v778_v5 = vld [vmem:[#allocation2 + $0x8] sm:$0xff] }
 0x17f   : > { %v550_v7 = vpop.f32.mrf.mxu0 }
 0x180   : > { %v551_v8 = vadd.f32 %v1862_v49, %v550_v7 }
 0x181   : > { %v2118_v9 = vpop.f32.mrf.mxu0 }
 0x182   : > { %584 = vxpose.xlu0.b32.cont [6/16] %v526_v62, 128  ;;  %v566_v14 = vadd.f32 %v2118_v9, %v1862_v49 }
 0x183   : > { %v560_v11 = vpop.f32.mrf.mxu0 }
 0x184   : > { %v561_v12 = vadd.f32 %v1862_v49, %v560_v11  ;;  %v780_v11 = vld [vmem:[#allocation2 + $0x40] sm:$0xff] }
 0x185   : > { %v2121_v13 = vpop.f32.mrf.mxu0 }
 0x186   : > { %585 = vxpose.xlu0.b32.cont [7/16] %v531_v0, 128  ;;  %v576_v17 = vadd.f32 %v2121_v13, %v1862_v49 }
 0x187   : > { %v570_v15 = vpop.f32.mrf.mxu0 }
 0x188   : > { %v571_v16 = vadd.f32 %v1862_v49, %v570_v15 }
 0x18a   : > { %586 = vxpose.xlu0.b32.cont [8/16] %v536_v2, 128  ;;  %v777_v2 = vld [vmem:[#allocation2 + $0x68] sm:$0xff] }
 0x18e   : > { %587 = vxpose.xlu0.b32.cont [9/16] %v541_v4, 128 }
 0x192   : > { %588 = vxpose.xlu0.b32.cont [10/16] %v546_v6, 128 }
 0x196   : > { %589 = vxpose.xlu0.b32.cont [11/16] %v551_v8, 128  ;;  %v779_v8 = vld [vmem:[#allocation2 + $0x48] sm:$0xff] }
 0x19a   : > { %590 = vxpose.xlu0.b32.cont [12/16] %v556_v10, 128 }
 0x19e   : > { %591 = vxpose.xlu0.b32.cont [13/16] %v561_v12, 128 }
 0x1a2   : > { %592 = vxpose.xlu0.b32.cont [14/16] %v566_v14, 128  ;;  %v781_v14 = vld [vmem:[#allocation2 + $0x20] sm:$0xff] }
 0x1a6   : > { %593 = vxpose.xlu0.b32.cont [15/16] %v571_v16, 128 }
 0x1aa   : > { %594 = vxpose.xlu0.b32.end [16/16] %v576_v17, 128  ;;  %v782_v17 = vld [vmem:[#allocation2 + $0x10] sm:$0xff] }
 0x1ea   : > { %v595_v18 = vpop.trf.xlu0 }
 0x1eb   : > { %2154 = vmatprep.mubr.f32.mxu1 %v595_v18 }
 0x1ee   : > { %v596_v19 = vpop.trf.xlu0 }
 0x1ef   : > { %2155 = vmatmul.mubr.f32.vlgmr.msra.gmra.mxu1 %v596_v19 }
 0x1f2   : > { %v597_v20 = vpop.trf.xlu0 }
 0x1f3   : > { %2157 = vmatprep.mubr.f32.mxu1 %v597_v20  ;;  %v783_v20 = vld [vmem:[#allocation2 + $0x38] sm:$0xff] }
 0x1f6   : > { %v598_v21 = vpop.trf.xlu0 }
 0x1f7   : > { %2158 = vmatmul.mubr.f32.gmra.mxu1 %v598_v21 }
 0x1fa   : > { %v599_v22 = vpop.trf.xlu0 }
 0x1fb   : > { %2160 = vmatprep.mubr.f32.mxu1 %v599_v22 }
 0x1fe   : > { %v600_v23 = vpop.trf.xlu0 }
 0x1ff   : > { %2161 = vmatmul.mubr.f32.gmra.mxu1 %v600_v23  ;;  %v784_v23 = vld [vmem:[#allocation2 + $0x60] sm:$0xff] }
 0x202   : > { %v601_v24 = vpop.trf.xlu0 }
 0x203   : > { %2163 = vmatprep.mubr.f32.mxu1 %v601_v24 }
 0x206   : > { %v602_v25 = vpop.trf.xlu0 }
 0x207   : > { %2164 = vmatmul.mubr.f32.gmra.mxu1 %v602_v25 }
 0x20a   : > { %v603_v26 = vpop.trf.xlu0 }
 0x20b   : > { %2166 = vmatprep.mubr.f32.mxu1 %v603_v26  ;;  %v785_v26 = vld [vmem:[#allocation2 + $0x70] sm:$0xff] }
 0x20e   : > { %v604_v27 = vpop.trf.xlu0 }
 0x20f   : > { %2167 = vmatmul.mubr.f32.gmra.mxu1 %v604_v27 }
 0x212   : > { %v605_v28 = vpop.trf.xlu0 }
 0x213   : > { %2169 = vmatprep.mubr.f32.mxu1 %v605_v28 }
 0x216   : > { %v606_v29 = vpop.trf.xlu0 }
 0x217   : > { %2170 = vmatmul.mubr.f32.gmra.mxu1 %v606_v29  ;;  %v786_v29 = vld [vmem:[#allocation2 + $0x78] sm:$0xff] }
 0x21a   : > { %v607_v30 = vpop.trf.xlu0 }
 0x21b   : > { %2172 = vmatprep.mubr.f32.mxu1 %v607_v30 }
 0x21e   : > { %v608_v31 = vpop.trf.xlu0 }
 0x21f   : > { %2173 = vmatmul.mubr.f32.gmra.mxu1 %v608_v31 }
 0x222   : > { %v609_v32 = vpop.trf.xlu0 }
 0x223   : > { %2175 = vmatprep.mubr.f32.mxu1 %v609_v32  ;;  %v787_v32 = vld [vmem:[#allocation2 + $0x28] sm:$0xff] }
 0x226   : > { %v610_v33 = vpop.trf.xlu0 }
 0x227   : > { %2176 = vmatmul.mubr.f32.gmra.mxu1 %v610_v33 }
 0x2af   : > { %v2156_v34 = vpop.f32.mrf.mxu1 }
 0x2b1   : > { %v693_v35 = vpop.f32.mrf.mxu1 }
 0x2b2   : > { %788 = vxpose.xlu1.b32.start [1/16] %v693_v35, 128 }
 0x2b6   : > { %789 = vxpose.xlu1.b32.cont [2/16] %v2156_v34, 128 }
 0x2b7   : > { %v2159_v36 = vpop.f32.mrf.mxu1 }
 0x2b9   : > { %v703_v37 = vpop.f32.mrf.mxu1 }
 0x2ba   : > { %790 = vxpose.xlu1.b32.cont [3/16] %v703_v37, 128 }
 0x2be   : > { %791 = vxpose.xlu1.b32.cont [4/16] %v2159_v36, 128 }
 0x2bf   : > { %v2162_v38 = vpop.f32.mrf.mxu1 }
 0x2c1   : > { %v713_v39 = vpop.f32.mrf.mxu1 }
 0x2c2   : > { %792 = vxpose.xlu1.b32.cont [5/16] %v713_v39, 128 }
 0x2c6   : > { %793 = vxpose.xlu1.b32.cont [6/16] %v2162_v38, 128 }
 0x2c7   : > { %v2165_v40 = vpop.f32.mrf.mxu1 }
 0x2c9   : > { %v723_v41 = vpop.f32.mrf.mxu1 }
 0x2ca   : > { %794 = vxpose.xlu1.b32.cont [7/16] %v723_v41, 128 }
 0x2ce   : > { %795 = vxpose.xlu1.b32.cont [8/16] %v2165_v40, 128 }
 0x2cf   : > { %v2168_v42 = vpop.f32.mrf.mxu1 }
 0x2d1   : > { %v733_v43 = vpop.f32.mrf.mxu1 }
 0x2d2   : > { %796 = vxpose.xlu1.b32.cont [9/16] %v733_v43, 128 }
 0x2d6   : > { %797 = vxpose.xlu1.b32.cont [10/16] %v2168_v42, 128 }
 0x2d7   : > { %v2171_v44 = vpop.f32.mrf.mxu1 }
 0x2d9   : > { %v743_v45 = vpop.f32.mrf.mxu1 }
 0x2da   : > { %798 = vxpose.xlu1.b32.cont [11/16] %v743_v45, 128 }
 0x2de   : > { %799 = vxpose.xlu1.b32.cont [12/16] %v2171_v44, 128 }
 0x2df   : > { %v2174_v46 = vpop.f32.mrf.mxu1 }
 0x2e1   : > { %v753_v47 = vpop.f32.mrf.mxu1 }
 0x2e2   : > { %800 = vxpose.xlu1.b32.cont [13/16] %v753_v47, 128 }
 0x2e6   : > { %801 = vxpose.xlu1.b32.cont [14/16] %v2174_v46, 128 }
 0x2e7   : > { %v2177_v48 = vpop.f32.mrf.mxu1 }
 0x2e9   : > { %v763_v49 = vpop.f32.mrf.mxu1 }
 0x2ea   : > { %802 = vxpose.xlu1.b32.cont [15/16] %v763_v49, 128 }
 0x2ee   : > { %803 = vxpose.xlu1.b32.end [16/16] %v2177_v48, 128 }
 0x32e   : > { %v804_v52 = vpop.trf.xlu1 }
 0x32f   : > { %v820_v53 = vadd.f32 %v804_v52, %v772_v51 }
 0x331   : > { %836 = vst [vmem:[#allocation2 + $0x30] sm:$0xff] %v820_v53 }
 0x332   : > { %v805_v55 = vpop.trf.xlu1 }
 0x333   : > { %v821_v56 = vadd.f32 %v805_v55, %v773_v54 }
 0x335   : > { %837 = vst [vmem:[#allocation2] sm:$0xff] %v821_v56 }
 0x336   : > { %v806_v58 = vpop.trf.xlu1 }
 0x337   : > { %v822_v59 = vadd.f32 %v806_v58, %v774_v57 }
 0x339   : > { %838 = vst [vmem:[#allocation2 + $0x58] sm:$0xff] %v822_v59 }
 0x33a   : > { %v807_v61 = vpop.trf.xlu1 }
 0x33b   : > { %v823_v62 = vadd.f32 %v807_v61, %v775_v60 }
 0x33d   : > { %839 = vst [vmem:[#allocation2 + $0x18] sm:$0xff] %v823_v62 }
 0x33e   : > { %v808_v0 = vpop.trf.xlu1 }
 0x33f   : > { %v824_v1 = vadd.f32 %v808_v0, %v776_v63 }
 0x341   : > { %840 = vst [vmem:[#allocation2 + $0x50] sm:$0xff] %v824_v1 }
 0x342   : > { %v809_v3 = vpop.trf.xlu1 }
 0x343   : > { %v825_v4 = vadd.f32 %v809_v3, %v777_v2 }
 0x345   : > { %841 = vst [vmem:[#allocation2 + $0x68] sm:$0xff] %v825_v4 }
 0x346   : > { %v810_v6 = vpop.trf.xlu1 }
 0x347   : > { %v826_v7 = vadd.f32 %v810_v6, %v778_v5 }
 0x349   : > { %842 = vst [vmem:[#allocation2 + $0x8] sm:$0xff] %v826_v7 }
 0x34a   : > { %v811_v9 = vpop.trf.xlu1 }
 0x34b   : > { %v827_v10 = vadd.f32 %v811_v9, %v779_v8 }
 0x34d   : > { %843 = vst [vmem:[#allocation2 + $0x48] sm:$0xff] %v827_v10 }
 0x34e   : > { %v812_v12 = vpop.trf.xlu1 }
 0x34f   : > { %v828_v13 = vadd.f32 %v812_v12, %v780_v11 }
 0x351   : > { %844 = vst [vmem:[#allocation2 + $0x40] sm:$0xff] %v828_v13 }
 0x352   : > { %v813_v15 = vpop.trf.xlu1 }
 0x353   : > { %v829_v16 = vadd.f32 %v813_v15, %v781_v14 }
 0x355   : > { %845 = vst [vmem:[#allocation2 + $0x20] sm:$0xff] %v829_v16 }
 0x356   : > { %v814_v18 = vpop.trf.xlu1 }
 0x357   : > { %v830_v19 = vadd.f32 %v814_v18, %v782_v17 }
 0x359   : > { %846 = vst [vmem:[#allocation2 + $0x10] sm:$0xff] %v830_v19 }
 0x35a   : > { %v815_v21 = vpop.trf.xlu1 }
 0x35b   : > { %v831_v22 = vadd.f32 %v815_v21, %v783_v20 }
 0x35d   : > { %847 = vst [vmem:[#allocation2 + $0x38] sm:$0xff] %v831_v22 }
 0x35e   : > { %v816_v24 = vpop.trf.xlu1 }
 0x35f   : > { %v832_v25 = vadd.f32 %v816_v24, %v784_v23 }
 0x361   : > { %848 = vst [vmem:[#allocation2 + $0x60] sm:$0xff] %v832_v25 }
 0x362   : > { %v817_v27 = vpop.trf.xlu1 }
 0x363   : > { %v833_v28 = vadd.f32 %v817_v27, %v785_v26 }
 0x365   : > { %849 = vst [vmem:[#allocation2 + $0x70] sm:$0xff] %v833_v28 }
 0x366   : > { %v818_v30 = vpop.trf.xlu1 }
 0x367   : > { %v834_v31 = vadd.f32 %v818_v30, %v786_v29 }
 0x369   : > { %850 = vst [vmem:[#allocation2 + $0x78] sm:$0xff] %v834_v31 }
 0x36a   : > { %v819_v33 = vpop.trf.xlu1 }
 0x36b   : > { %v835_v34 = vadd.f32 %v819_v33, %v787_v32 }
 0x36d   : > { %851 = vst [vmem:[#allocation2 + $0x28] sm:$0xff] %v835_v34 }
 0x36e PF: > { %p1863_p4 = scmp.ne.s32.totalorder %s2781_s25, 1 }
 0x370   : > { %871 = sbr.rel (%p1863_p4) target bundleno = 1825 (0x721), region = 72 }
 0x375   : > { %v903_v35 = vld [vmem:[#allocation2 + $0x28] sm:$0xff]  ;;  %v902_v36 = vld [vmem:[#allocation2 + $0x78] sm:$0xff]  ;;  %v901_v37 = vld [vmem:[#allocation2 + $0x70] sm:$0xff] }
 0x376   : > { %2178 = vmatprep.subr.mxu0 %v903_v35  ;;  %v900_v38 = vld [vmem:[#allocation2 + $0x60] sm:$0xff]  ;;  %v899_v40 = vld [vmem:[#allocation2 + $0x38] sm:$0xff]  ;;  %v898_v41 = vld [vmem:[#allocation2 + $0x10] sm:$0xff] }
 0x377   : > { %2179 = vmatpush3.msra.mxu0 %v903_v35  ;;  %v3087_v39 = vld [vmem:[%s3008_s26] sm:$0xff]  ;;  %v1080_v43 = vld [vmem:[#allocation10 + $0x78] sm:$0xff]  ;;  %v1079_v44 = vld [vmem:[#allocation10 + $0x70] sm:$0xff] }
 0x378   : > { %2180 = vmatprep.subr.mxu0 %v902_v36  ;;  %2210 = vmatprep.mubr.f32.mxu0 %v3087_v39  ;;  %v897_v42 = vld [vmem:[#allocation2 + $0x20] sm:$0xff]  ;;  %v1078_v46 = vld [vmem:[#allocation10 + $0x68] sm:$0xff]  ;;  %v1076_v50 = vld [vmem:[#allocation10 + $0x58] sm:$0xff] }
 0x379   : > { %2181 = vmatpush3.msra.mxu0 %v902_v36  ;;  %2234 = vmatprep.subr.mxu1 %v1080_v43  ;;  %v896_v45 = vld [vmem:[#allocation2 + $0x40] sm:$0xff]  ;;  %v895_v47 = vld [vmem:[#allocation2 + $0x48] sm:$0xff]  ;;  %v1075_v52 = vld [vmem:[#allocation10 + $0x50] sm:$0xff] }
 0x37a   : > { %2182 = vmatprep.subr.mxu0 %v901_v37  ;;  %2235 = vmatpush3.msra.mxu1 %v1080_v43  ;;  %v1077_v48 = vld [vmem:[#allocation10 + $0x60] sm:$0xff]  ;;  %v894_v49 = vld [vmem:[#allocation2 + $0x8] sm:$0xff]  ;;  %v892_v53 = vld [vmem:[#allocation2 + $0x50] sm:$0xff] }
 0x37b   : > { %2183 = vmatpush3.msra.mxu0 %v901_v37  ;;  %2236 = vmatprep.subr.mxu1 %v1079_v44  ;;  %v893_v51 = vld [vmem:[#allocation2 + $0x68] sm:$0xff]  ;;  %v891_v55 = vld [vmem:[#allocation2 + $0x18] sm:$0xff]  ;;  %v1073_v56 = vld [vmem:[#allocation10 + $0x40] sm:$0xff] }
 0x37c   : > { %2184 = vmatprep.subr.mxu0 %v900_v38  ;;  %2237 = vmatpush3.msra.mxu1 %v1079_v44  ;;  %v1074_v54 = vld [vmem:[#allocation10 + $0x48] sm:$0xff]  ;;  %v890_v57 = vld [vmem:[#allocation2 + $0x58] sm:$0xff]  ;;  %v889_v59 = vld [vmem:[#allocation2] sm:$0xff] }
 0x37d   : > { %2185 = vmatpush3.msra.mxu0 %v900_v38  ;;  %2238 = vmatprep.subr.mxu1 %v1078_v46  ;;  %v1072_v58 = vld [vmem:[#allocation10 + $0x38] sm:$0xff]  ;;  %v1071_v60 = vld [vmem:[#allocation10 + $0x30] sm:$0xff]  ;;  %v1070_v62 = vld [vmem:[#allocation10 + $0x28] sm:$0xff] }
 0x37e   : > { %2186 = vmatprep.subr.mxu0 %v899_v40  ;;  %2239 = vmatpush3.msra.mxu1 %v1078_v46  ;;  %v888_v61 = vld [vmem:[#allocation2 + $0x30] sm:$0xff]  ;;  %v3091_v63 = vld [vmem:[%s3008_s26 + $0x8] sm:$0xff]  ;;  %v1069_v0 = vld [vmem:[#allocation10 + $0x20] sm:$0xff] }
 0x37f   : > { %2187 = vmatpush3.msra.mxu0 %v899_v40  ;;  %2240 = vmatprep.subr.mxu1 %v1077_v48  ;;  %v3094_v1 = vld [vmem:[%s3008_s26 + $0x10] sm:$0xff]  ;;  %v1068_v2 = vld [vmem:[#allocation10 + $0x18] sm:$0xff]  ;;  %v3105_v5 = vld [vmem:[%s3008_s26 + $0x20] sm:$0xff] }
 0x380   : > { %2188 = vmatprep.subr.mxu0 %v898_v41  ;;  %2241 = vmatpush3.msra.mxu1 %v1077_v48  ;;  %v3099_v3 = vld [vmem:[%s3008_s26 + $0x18] sm:$0xff]  ;;  %v3109_v6 = vld [vmem:[%s3008_s26 + $0x70] sm:$0xff]  ;;  %v3116_v7 = vld [vmem:[%s3008_s26 + $0x28] sm:$0xff] }
 0x381   : > { %2189 = vmatpush3.msra.mxu0 %v898_v41  ;;  %2242 = vmatprep.subr.mxu1 %v1076_v50  ;;  %v3102_v4 = vld [vmem:[%s3008_s26 + $0x78] sm:$0xff]  ;;  %v3119_v8 = vld [vmem:[%s3008_s26 + $0x68] sm:$0xff]  ;;  %v3123_v9 = vld [vmem:[%s3008_s26 + $0x30] sm:$0xff] }
 0x382   : > { %2190 = vmatprep.subr.mxu0 %v897_v42  ;;  %2243 = vmatpush3.msra.mxu1 %v1076_v50  ;;  %v3127_v10 = vld [vmem:[%s3008_s26 + $0x60] sm:$0xff]  ;;  %v3134_v11 = vld [vmem:[%s3008_s26 + $0x38] sm:$0xff]  ;;  %v3145_v14 = vld [vmem:[%s3008_s26 + $0x50] sm:$0xff] }
 0x383   : > { %2191 = vmatpush3.msra.mxu0 %v897_v42  ;;  %2244 = vmatprep.subr.mxu1 %v1075_v52  ;;  %v3137_v12 = vld [vmem:[%s3008_s26 + $0x58] sm:$0xff]  ;;  %v3141_v13 = vld [vmem:[%s3008_s26 + $0x40] sm:$0xff]  ;;  %v3152_v15 = vld [vmem:[%s3008_s26 + $0x48] sm:$0xff] }
 0x384   : > { %2192 = vmatprep.subr.mxu0 %v896_v45  ;;  %2245 = vmatpush3.msra.mxu1 %v1075_v52  ;;  %v1067_v16 = vld [vmem:[#allocation10 + $0x10] sm:$0xff]  ;;  %v1066_v17 = vld [vmem:[#allocation10 + $0x8] sm:$0xff]  ;;  %v1065_v18 = vld [vmem:[#allocation10] sm:$0xff] }
 0x385   : > { %2193 = vmatpush3.msra.mxu0 %v896_v45  ;;  %2246 = vmatprep.subr.mxu1 %v1074_v54 }
 0x386   : > { %2194 = vmatprep.subr.mxu0 %v895_v47  ;;  %2247 = vmatpush3.msra.mxu1 %v1074_v54 }
 0x387   : > { %2195 = vmatpush3.msra.mxu0 %v895_v47  ;;  %2248 = vmatprep.subr.mxu1 %v1073_v56 }
 0x388   : > { %2196 = vmatprep.subr.mxu0 %v894_v49  ;;  %2249 = vmatpush3.msra.mxu1 %v1073_v56 }
 0x389   : > { %2197 = vmatpush3.msra.mxu0 %v894_v49  ;;  %2250 = vmatprep.subr.mxu1 %v1072_v58 }
 0x38a   : > { %2198 = vmatprep.subr.mxu0 %v893_v51  ;;  %2251 = vmatpush3.msra.mxu1 %v1072_v58 }
 0x38b   : > { %2199 = vmatpush3.msra.mxu0 %v893_v51  ;;  %2252 = vmatprep.subr.mxu1 %v1071_v60 }
 0x38c   : > { %2200 = vmatprep.subr.mxu0 %v892_v53  ;;  %2253 = vmatpush3.msra.mxu1 %v1071_v60 }
 0x38d   : > { %2201 = vmatpush3.msra.mxu0 %v892_v53  ;;  %2254 = vmatprep.subr.mxu1 %v1070_v62  ;;  %v1864_v53 = vld [vmem:[%s3331_s5] ss:$0 sm:$0xff] }
 0x38e   : > { %2202 = vmatprep.subr.mxu0 %v891_v55  ;;  %2255 = vmatpush3.msra.mxu1 %v1070_v62 }
 0x38f   : > { %2203 = vmatpush3.msra.mxu0 %v891_v55  ;;  %2256 = vmatprep.subr.mxu1 %v1069_v0 }
 0x390   : > { %2204 = vmatprep.subr.mxu0 %v890_v57  ;;  %2257 = vmatpush3.msra.mxu1 %v1069_v0 }
 0x391   : > { %2205 = vmatpush3.msra.mxu0 %v890_v57  ;;  %2258 = vmatprep.subr.mxu1 %v1068_v2 }
 0x392   : > { %2206 = vmatprep.subr.mxu0 %v889_v59  ;;  %2259 = vmatpush3.msra.mxu1 %v1068_v2 }
 0x393   : > { %2207 = vmatpush3.msra.mxu0 %v889_v59  ;;  %2260 = vmatprep.subr.mxu1 %v1067_v16 }
 0x394   : > { %2208 = vmatprep.subr.mxu0 %v888_v61  ;;  %2261 = vmatpush3.msra.mxu1 %v1067_v16 }
 0x395   : > { %2209 = vmatpush3.msra.mxu0 %v888_v61  ;;  %2262 = vmatprep.subr.mxu1 %v1066_v17 }
 0x396   : > { %2211 = vmatmul.mubr.f32.vlgmr.msra.gmra.mxu0 %v3091_v63  ;;  %2290 = vmatprep.subr.mxu0 %v3102_v4 }
 0x397   : > { %2213 = vmatprep.mubr.f32.mxu0 %v3094_v1  ;;  %2291 = vmatpush3.msra.mxu0 %v3102_v4 }
 0x398   : > { %2292 = vmatprep.subr.mxu0 %v3109_v6  ;;  %2263 = vmatpush3.msra.mxu1 %v1066_v17 }
 0x399   : > { %2293 = vmatpush3.msra.mxu0 %v3109_v6  ;;  %2264 = vmatprep.subr.mxu1 %v1065_v18 }
 0x39a   : > { %2214 = vmatmul.mubr.f32.gmra.mxu0 %v3099_v3  ;;  %2294 = vmatprep.subr.mxu0 %v3119_v8 }
 0x39b   : > { %2216 = vmatprep.mubr.f32.mxu0 %v3105_v5  ;;  %2295 = vmatpush3.msra.mxu0 %v3119_v8 }
 0x39c   : > { %2296 = vmatprep.subr.mxu0 %v3127_v10  ;;  %2265 = vmatpush3.msra.mxu1 %v1065_v18 }
 0x39d   : > { %2297 = vmatpush3.msra.mxu0 %v3127_v10  ;;  %2402 = vmatprep.subr.mxu1 %v3102_v4 }
 0x39e   : > { %2217 = vmatmul.mubr.f32.gmra.mxu0 %v3116_v7  ;;  %2298 = vmatprep.subr.mxu0 %v3137_v12 }
 0x39f   : > { %2219 = vmatprep.mubr.f32.mxu0 %v3123_v9  ;;  %2299 = vmatpush3.msra.mxu0 %v3137_v12 }
 0x3a0   : > { %2300 = vmatprep.subr.mxu0 %v3145_v14 }
 0x3a1   : > { %2301 = vmatpush3.msra.mxu0 %v3145_v14 }
 0x3a2   : > { %2220 = vmatmul.mubr.f32.gmra.mxu0 %v3134_v11  ;;  %2302 = vmatprep.subr.mxu0 %v3152_v15 }
 0x3a3   : > { %2222 = vmatprep.mubr.f32.mxu0 %v3141_v13  ;;  %2303 = vmatpush3.msra.mxu0 %v3152_v15 }
 0x3a4   : > { %2304 = vmatprep.subr.mxu0 %v3141_v13 }
 0x3a5   : > { %2305 = vmatpush3.msra.mxu0 %v3141_v13 }
 0x3a6   : > { %2223 = vmatmul.mubr.f32.gmra.mxu0 %v3152_v15  ;;  %2306 = vmatprep.subr.mxu0 %v3134_v11 }
 0x3a7   : > { %2225 = vmatprep.mubr.f32.mxu0 %v3145_v14  ;;  %2307 = vmatpush3.msra.mxu0 %v3134_v11 }
 0x3a8   : > { %2308 = vmatprep.subr.mxu0 %v3123_v9 }
 0x3a9   : > { %2309 = vmatpush3.msra.mxu0 %v3123_v9 }
 0x3aa   : > { %2226 = vmatmul.mubr.f32.gmra.mxu0 %v3137_v12  ;;  %2310 = vmatprep.subr.mxu0 %v3116_v7 }
 0x3ab   : > { %2228 = vmatprep.mubr.f32.mxu0 %v3127_v10  ;;  %2311 = vmatpush3.msra.mxu0 %v3116_v7 }
 0x3ac   : > { %2312 = vmatprep.subr.mxu0 %v3105_v5 }
 0x3ad   : > { %2313 = vmatpush3.msra.mxu0 %v3105_v5 }
 0x3ae   : > { %2229 = vmatmul.mubr.f32.gmra.mxu0 %v3119_v8  ;;  %2314 = vmatprep.subr.mxu0 %v3099_v3 }
 0x3af   : > { %2231 = vmatprep.mubr.f32.mxu0 %v3109_v6  ;;  %2315 = vmatpush3.msra.mxu0 %v3099_v3 }
 0x3b0   : > { %2316 = vmatprep.subr.mxu0 %v3094_v1 }
 0x3b1   : > { %2317 = vmatpush3.msra.mxu0 %v3094_v1 }
 0x3b2   : > { %2232 = vmatmul.mubr.f32.gmra.mxu0 %v3102_v4  ;;  %2318 = vmatprep.subr.mxu0 %v3091_v63 }
 0x3b3   : > { %2319 = vmatpush3.msra.mxu0 %v3091_v63 }
 0x3b4   : > { %2320 = vmatprep.subr.mxu0 %v3087_v39 }
 0x3b5   : > { %2321 = vmatpush3.msra.mxu0 %v3087_v39 }
 0x456   : > { %v2212_v19 = vpop.f32.mrf.mxu0 }
 0x457   : > { %v1050_v22 = vmax.f32 %v2212_v19, 0.0 }
 0x458   : > { %v970_v20 = vpop.f32.mrf.mxu0 }
 0x459   : > { %v1049_v21 = vmax.f32 %v970_v20, 0.0 }
 0x45a   : > { %v2215_v23 = vpop.f32.mrf.mxu0 }
 0x45b   : > { %2266 = vmatprep.mubr.f32.mxu1 %v1049_v21  ;;  %v1052_v24 = vmax.f32 %v2215_v23, 0.0 }
 0x45c   : > { %v980_v25 = vpop.f32.mrf.mxu0  ;;  %2267 = vmatmul.mubr.f32.vlgmr.msra.gmra.mxu1 %v1050_v22 }
 0x45d   : > { %v1051_v26 = vmax.f32 %v980_v25, 0.0  ;;  %2418 = vmatpush3.msra.mxu1 %v3102_v4 }
 0x45e   : > { %v2218_v27 = vpop.f32.mrf.mxu0  ;;  %2403 = vmatprep.subr.mxu1 %v3109_v6 }
 0x45f   : > { %2269 = vmatprep.mubr.f32.mxu1 %v1051_v26  ;;  %2419 = vmatpush3.msra.mxu1 %v3109_v6  ;;  %v1054_v28 = vmax.f32 %v2218_v27, 0.0 }
 0x460   : > { %2270 = vmatmul.mubr.f32.gmra.mxu1 %v1052_v24  ;;  %v990_v29 = vpop.f32.mrf.mxu0  ;;  %2404 = vmatprep.subr.mxu1 %v3119_v8 }
 0x461   : > { %v1053_v30 = vmax.f32 %v990_v29, 0.0  ;;  %2420 = vmatpush3.msra.mxu1 %v3119_v8 }
 0x462   : > { %v2221_v31 = vpop.f32.mrf.mxu0  ;;  %2405 = vmatprep.subr.mxu1 %v3127_v10 }
 0x463   : > { %2272 = vmatprep.mubr.f32.mxu1 %v1053_v30  ;;  %2421 = vmatpush3.msra.mxu1 %v3127_v10  ;;  %v1056_v32 = vmax.f32 %v2221_v31, 0.0 }
 0x464   : > { %2273 = vmatmul.mubr.f32.gmra.mxu1 %v1054_v28  ;;  %v1000_v33 = vpop.f32.mrf.mxu0  ;;  %2406 = vmatprep.subr.mxu1 %v3137_v12 }
 0x465   : > { %v1055_v34 = vmax.f32 %v1000_v33, 0.0  ;;  %2422 = vmatpush3.msra.mxu1 %v3137_v12 }
 0x466   : > { %v2224_v35 = vpop.f32.mrf.mxu0  ;;  %2407 = vmatprep.subr.mxu1 %v3145_v14 }
 0x467   : > { %2275 = vmatprep.mubr.f32.mxu1 %v1055_v34  ;;  %2423 = vmatpush3.msra.mxu1 %v3145_v14  ;;  %v1058_v36 = vmax.f32 %v2224_v35, 0.0 }
 0x468   : > { %2276 = vmatmul.mubr.f32.gmra.mxu1 %v1056_v32  ;;  %v1010_v37 = vpop.f32.mrf.mxu0  ;;  %2408 = vmatprep.subr.mxu1 %v3152_v15 }
 0x469   : > { %v1057_v38 = vmax.f32 %v1010_v37, 0.0  ;;  %2424 = vmatpush3.msra.mxu1 %v3152_v15 }
 0x46a   : > { %v2227_v40 = vpop.f32.mrf.mxu0  ;;  %2409 = vmatprep.subr.mxu1 %v3141_v13 }
 0x46b   : > { %2278 = vmatprep.mubr.f32.mxu1 %v1057_v38  ;;  %2425 = vmatpush3.msra.mxu1 %v3141_v13  ;;  %v1060_v41 = vmax.f32 %v2227_v40, 0.0 }
 0x46c   : > { %2279 = vmatmul.mubr.f32.gmra.mxu1 %v1058_v36  ;;  %v1020_v42 = vpop.f32.mrf.mxu0  ;;  %2410 = vmatprep.subr.mxu1 %v3134_v11 }
 0x46d   : > { %v1059_v43 = vmax.f32 %v1020_v42, 0.0  ;;  %2426 = vmatpush3.msra.mxu1 %v3134_v11 }
 0x46e   : > { %v2230_v44 = vpop.f32.mrf.mxu0  ;;  %2411 = vmatprep.subr.mxu1 %v3123_v9 }
 0x46f   : > { %2281 = vmatprep.mubr.f32.mxu1 %v1059_v43  ;;  %2427 = vmatpush3.msra.mxu1 %v3123_v9  ;;  %v1062_v45 = vmax.f32 %v2230_v44, 0.0 }
 0x470   : > { %2282 = vmatmul.mubr.f32.gmra.mxu1 %v1060_v41  ;;  %v1030_v46 = vpop.f32.mrf.mxu0  ;;  %2412 = vmatprep.subr.mxu1 %v3116_v7 }
 0x471   : > { %v1061_v47 = vmax.f32 %v1030_v46, 0.0  ;;  %2428 = vmatpush3.msra.mxu1 %v3116_v7 }
 0x472   : > { %v2233_v48 = vpop.f32.mrf.mxu0  ;;  %2413 = vmatprep.subr.mxu1 %v3105_v5 }
 0x473   : > { %2284 = vmatprep.mubr.f32.mxu1 %v1061_v47  ;;  %2429 = vmatpush3.msra.mxu1 %v3105_v5  ;;  %v1064_v49 = vmax.f32 %v2233_v48, 0.0 }
 0x474   : > { %2285 = vmatmul.mubr.f32.gmra.mxu1 %v1062_v45  ;;  %v1040_v50 = vpop.f32.mrf.mxu0  ;;  %2414 = vmatprep.subr.mxu1 %v3099_v3 }
 0x475   : > { %v1063_v51 = vmax.f32 %v1040_v50, 0.0  ;;  %2430 = vmatpush3.msra.mxu1 %v3099_v3 }
 0x476   : > { %2415 = vmatprep.subr.mxu1 %v3094_v1 }
 0x477   : > { %2287 = vmatprep.mubr.f32.mxu1 %v1063_v51  ;;  %2431 = vmatpush3.msra.mxu1 %v3094_v1 }
 0x478   : > { %2288 = vmatmul.mubr.f32.gmra.mxu1 %v1064_v49  ;;  %2416 = vmatprep.subr.mxu1 %v3091_v63 }
 0x479   : > { %2432 = vmatpush3.msra.mxu1 %v3091_v63 }
 0x47a   : > { %2417 = vmatprep.subr.mxu1 %v3087_v39 }
 0x47b   : > { %2433 = vmatpush3.msra.mxu1 %v3087_v39 }
 0x51c   : > { %v2268_v52 = vpop.f32.mrf.mxu1 }
 0x51d   : > { %v1160_v57 = vadd.f32 %v2268_v52, %v1864_v53 }
 0x51e   : > { %v1154_v54 = vpop.f32.mrf.mxu1 }
 0x51f   : > { %v1155_v55 = vadd.f32 %v1864_v53, %v1154_v54  ;;  %v1410_v54 = vld [vmem:[#allocation3 + $0x28] sm:$0xff] }
 0x520   : > { %v2271_v56 = vpop.f32.mrf.mxu1 }
 0x521   : > { %1233 = vxpose.xlu0.b32.start [1/16] %v1155_v55, 128  ;;  %v1170_v61 = vadd.f32 %v2271_v56, %v1864_v53 }
 0x522   : > { %v1164_v58 = vpop.f32.mrf.mxu1 }
 0x523   : > { %v1165_v59 = vadd.f32 %v1864_v53, %v1164_v58 }
 0x524   : > { %v2274_v60 = vpop.f32.mrf.mxu1 }
 0x525   : > { %1234 = vxpose.xlu0.b32.cont [2/16] %v1160_v57, 128  ;;  %v1180_v0 = vadd.f32 %v2274_v60, %v1864_v53  ;;  %v1411_v57 = vld [vmem:[#allocation3 + $0x68] sm:$0xff]  ;;  %v1412_v60 = vld [vmem:[#allocation3 + $0x10] sm:$0xff] }
 0x526   : > { %v1174_v62 = vpop.f32.mrf.mxu1 }
 0x527   : > { %v1175_v63 = vadd.f32 %v1864_v53, %v1174_v62 }
 0x528   : > { %v2277_v39 = vpop.f32.mrf.mxu1 }
 0x529   : > { %1235 = vxpose.xlu0.b32.cont [3/16] %v1165_v59, 128  ;;  %v1190_v4 = vadd.f32 %v2277_v39, %v1864_v53 }
 0x52a   : > { %v1184_v1 = vpop.f32.mrf.mxu1 }
 0x52b   : > { %v1185_v2 = vadd.f32 %v1864_v53, %v1184_v1  ;;  %v1414_v1 = vld [vmem:[#allocation3 + $0x48] sm:$0xff] }
 0x52c   : > { %v2280_v3 = vpop.f32.mrf.mxu1 }
 0x52d   : > { %1236 = vxpose.xlu0.b32.cont [4/16] %v1170_v61, 128  ;;  %v1200_v8 = vadd.f32 %v2280_v3, %v1864_v53 }
 0x52e   : > { %v1194_v5 = vpop.f32.mrf.mxu1 }
 0x52f   : > { %v1195_v6 = vadd.f32 %v1864_v53, %v1194_v5 }
 0x530   : > { %v2283_v7 = vpop.f32.mrf.mxu1 }
 0x531   : > { %1237 = vxpose.xlu0.b32.cont [5/16] %v1175_v63, 128  ;;  %v1210_v12 = vadd.f32 %v2283_v7, %v1864_v53  ;;  %v1413_v63 = vld [vmem:[#allocation3 + $0x40] sm:$0xff]  ;;  %v1416_v7 = vld [vmem:[#allocation3 + $0x70] sm:$0xff] }
 0x532   : > { %v1204_v9 = vpop.f32.mrf.mxu1 }
 0x533   : > { %v1205_v10 = vadd.f32 %v1864_v53, %v1204_v9 }
 0x534   : > { %v2286_v11 = vpop.f32.mrf.mxu1 }
 0x535   : > { %1238 = vxpose.xlu0.b32.cont [6/16] %v1180_v0, 128  ;;  %v1220_v16 = vadd.f32 %v2286_v11, %v1864_v53 }
 0x536   : > { %v1214_v13 = vpop.f32.mrf.mxu1 }
 0x537   : > { %v1215_v14 = vadd.f32 %v1864_v53, %v1214_v13  ;;  %v1418_v13 = vld [vmem:[#allocation3 + $0x20] sm:$0xff] }
 0x538   : > { %v2289_v15 = vpop.f32.mrf.mxu1 }
 0x539   : > { %1239 = vxpose.xlu0.b32.cont [7/16] %v1185_v2, 128  ;;  %v1230_v19 = vadd.f32 %v2289_v15, %v1864_v53 }
 0x53a   : > { %v1224_v17 = vpop.f32.mrf.mxu1 }
 0x53b   : > { %v1225_v18 = vadd.f32 %v1864_v53, %v1224_v17  ;;  %v2803_v53 = vmov 0.0  }
 0x53c   : > { %1490 = vst [vmem:[%s3031_s10] sm:$0xff] %v2803_v53  ;;  %1491 = vst [vmem:[%s3031_s10 + $0x8] sm:$0xff] %v2803_v53 }
 0x53d   : > { %1240 = vxpose.xlu0.b32.cont [8/16] %v1190_v4, 128  ;;  %1492 = vst [vmem:[%s3031_s10 + $0x10] sm:$0xff] %v2803_v53  ;;  %1493 = vst [vmem:[%s3031_s10 + $0x18] sm:$0xff] %v2803_v53  ;;  %v1415_v4 = vld [vmem:[#allocation3 + $0x30] sm:$0xff] }
 0x53e   : > { %1494 = vst [vmem:[%s3031_s10 + $0x20] sm:$0xff] %v2803_v53  ;;  %1495 = vst [vmem:[%s3031_s10 + $0x28] sm:$0xff] %v2803_v53 }
 0x53f   : > { %1496 = vst [vmem:[%s3031_s10 + $0x30] sm:$0xff] %v2803_v53  ;;  %1497 = vst [vmem:[%s3031_s10 + $0x38] sm:$0xff] %v2803_v53 }
 0x540   : > { %1498 = vst [vmem:[%s3031_s10 + $0x40] sm:$0xff] %v2803_v53  ;;  %1499 = vst [vmem:[%s3031_s10 + $0x48] sm:$0xff] %v2803_v53 }
 0x541   : > { %1241 = vxpose.xlu0.b32.cont [9/16] %v1195_v6, 128  ;;  %1500 = vst [vmem:[%s3031_s10 + $0x50] sm:$0xff] %v2803_v53  ;;  %1501 = vst [vmem:[%s3031_s10 + $0x58] sm:$0xff] %v2803_v53 }
 0x542   : > { %1502 = vst [vmem:[%s3031_s10 + $0x60] sm:$0xff] %v2803_v53  ;;  %1503 = vst [vmem:[%s3031_s10 + $0x68] sm:$0xff] %v2803_v53 }
 0x543   : > { %1504 = vst [vmem:[%s3031_s10 + $0x70] sm:$0xff] %v2803_v53  ;;  %1505 = vst [vmem:[%s3031_s10 + $0x78] sm:$0xff] %v2803_v53 }
 0x545   : > { %1242 = vxpose.xlu0.b32.cont [10/16] %v1200_v8, 128 }
 0x549   : > { %1243 = vxpose.xlu0.b32.cont [11/16] %v1205_v10, 128  ;;  %v1417_v10 = vld [vmem:[#allocation3 + $0x38] sm:$0xff] }
 0x54d   : > { %1244 = vxpose.xlu0.b32.cont [12/16] %v1210_v12, 128 }
 0x551   : > { %1245 = vxpose.xlu0.b32.cont [13/16] %v1215_v14, 128 }
 0x555   : > { %1246 = vxpose.xlu0.b32.cont [14/16] %v1220_v16, 128  ;;  %v1419_v16 = vld [vmem:[#allocation3 + $0x78] sm:$0xff] }
 0x559   : > { %1247 = vxpose.xlu0.b32.cont [15/16] %v1225_v18, 128 }
 0x55d   : > { %1248 = vxpose.xlu0.b32.end [16/16] %v1230_v19, 128  ;;  %v1420_v19 = vld [vmem:[#allocation3 + $0x18] sm:$0xff] }
 0x59d   : > { %v1249_v20 = vpop.trf.xlu0 }
 0x59e   : > { %2322 = vmatprep.mubr.f32.mxu0 %v1249_v20 }
 0x5a1   : > { %v1250_v21 = vpop.trf.xlu0 }
 0x5a2   : > { %2323 = vmatmul.mubr.f32.vlgmr.msra.gmra.mxu0 %v1250_v21 }
 0x5a5   : > { %v1251_v22 = vpop.trf.xlu0 }
 0x5a6   : > { %2325 = vmatprep.mubr.f32.mxu0 %v1251_v22  ;;  %v1421_v22 = vld [vmem:[#allocation3 + $0x58] sm:$0xff] }
 0x5a9   : > { %v1252_v23 = vpop.trf.xlu0 }
 0x5aa   : > { %2326 = vmatmul.mubr.f32.gmra.mxu0 %v1252_v23 }
 0x5ad   : > { %v1253_v24 = vpop.trf.xlu0 }
 0x5ae   : > { %2328 = vmatprep.mubr.f32.mxu0 %v1253_v24 }
 0x5b1   : > { %v1254_v25 = vpop.trf.xlu0 }
 0x5b2   : > { %2329 = vmatmul.mubr.f32.gmra.mxu0 %v1254_v25  ;;  %v1422_v25 = vld [vmem:[#allocation3] sm:$0xff] }
 0x5b5   : > { %v1255_v26 = vpop.trf.xlu0 }
 0x5b6   : > { %2331 = vmatprep.mubr.f32.mxu0 %v1255_v26 }
 0x5b9   : > { %v1256_v27 = vpop.trf.xlu0 }
 0x5ba   : > { %2332 = vmatmul.mubr.f32.gmra.mxu0 %v1256_v27 }
 0x5bd   : > { %v1257_v28 = vpop.trf.xlu0 }
 0x5be   : > { %2334 = vmatprep.mubr.f32.mxu1 %v1257_v28  ;;  %v1423_v28 = vld [vmem:[#allocation3 + $0x8] sm:$0xff] }
 0x5c1   : > { %v1258_v29 = vpop.trf.xlu0 }
 0x5c2   : > { %2335 = vmatmul.mubr.f32.vlgmr.msra.gmra.mxu1 %v1258_v29 }
 0x5c5   : > { %v1259_v30 = vpop.trf.xlu0 }
 0x5c6   : > { %2337 = vmatprep.mubr.f32.mxu1 %v1259_v30 }
 0x5c9   : > { %v1260_v31 = vpop.trf.xlu0 }
 0x5ca   : > { %2338 = vmatmul.mubr.f32.gmra.mxu1 %v1260_v31  ;;  %v1424_v31 = vld [vmem:[#allocation3 + $0x60] sm:$0xff] }
 0x5cd   : > { %v1261_v32 = vpop.trf.xlu0 }
 0x5ce   : > { %2340 = vmatprep.mubr.f32.mxu1 %v1261_v32 }
 0x5d1   : > { %v1262_v33 = vpop.trf.xlu0 }
 0x5d2   : > { %2341 = vmatmul.mubr.f32.gmra.mxu1 %v1262_v33 }
 0x5d5   : > { %v1263_v34 = vpop.trf.xlu0 }
 0x5d6   : > { %2343 = vmatprep.mubr.f32.mxu1 %v1263_v34  ;;  %v1425_v34 = vld [vmem:[#allocation3 + $0x50] sm:$0xff] }
 0x5d9   : > { %v1264_v35 = vpop.trf.xlu0 }
 0x5da   : > { %2344 = vmatmul.mubr.f32.gmra.mxu1 %v1264_v35 }
 0x662   : > { %v2324_v36 = vpop.f32.mrf.mxu0 }
 0x664   : > { %v1331_v37 = vpop.f32.mrf.mxu0 }
 0x665   : > { %1426 = vxpose.xlu1.b32.start [1/16] %v1331_v37, 128 }
 0x669   : > { %1427 = vxpose.xlu1.b32.cont [2/16] %v2324_v36, 128 }
 0x66a   : > { %v2327_v38 = vpop.f32.mrf.mxu0 }
 0x66c   : > { %v1341_v40 = vpop.f32.mrf.mxu0 }
 0x66d   : > { %1428 = vxpose.xlu1.b32.cont [3/16] %v1341_v40, 128 }
 0x671   : > { %1429 = vxpose.xlu1.b32.cont [4/16] %v2327_v38, 128 }
 0x672   : > { %v2330_v41 = vpop.f32.mrf.mxu0 }
 0x674   : > { %v1351_v42 = vpop.f32.mrf.mxu0 }
 0x675   : > { %1430 = vxpose.xlu1.b32.cont [5/16] %v1351_v42, 128 }
 0x679   : > { %1431 = vxpose.xlu1.b32.cont [6/16] %v2330_v41, 128 }
 0x67a   : > { %v2333_v43 = vpop.f32.mrf.mxu0 }
 0x67c   : > { %v1361_v44 = vpop.f32.mrf.mxu0 }
 0x67d   : > { %1432 = vxpose.xlu1.b32.cont [7/16] %v1361_v44, 128 }
 0x681   : > { %1433 = vxpose.xlu1.b32.cont [8/16] %v2333_v43, 128 }
 0x682   : > { %v2336_v45 = vpop.f32.mrf.mxu1 }
 0x684   : > { %v1371_v46 = vpop.f32.mrf.mxu1 }
 0x685   : > { %1434 = vxpose.xlu1.b32.cont [9/16] %v1371_v46, 128 }
 0x689   : > { %1435 = vxpose.xlu1.b32.cont [10/16] %v2336_v45, 128 }
 0x68a   : > { %v2339_v47 = vpop.f32.mrf.mxu1 }
 0x68c   : > { %v1381_v48 = vpop.f32.mrf.mxu1 }
 0x68d   : > { %1436 = vxpose.xlu1.b32.cont [11/16] %v1381_v48, 128 }
 0x691   : > { %1437 = vxpose.xlu1.b32.cont [12/16] %v2339_v47, 128 }
 0x692   : > { %v2342_v49 = vpop.f32.mrf.mxu1 }
 0x694   : > { %v1391_v50 = vpop.f32.mrf.mxu1 }
 0x695   : > { %1438 = vxpose.xlu1.b32.cont [13/16] %v1391_v50, 128 }
 0x699   : > { %1439 = vxpose.xlu1.b32.cont [14/16] %v2342_v49, 128 }
 0x69a   : > { %v2345_v51 = vpop.f32.mrf.mxu1 }
 0x69c   : > { %v1401_v52 = vpop.f32.mrf.mxu1 }
 0x69d   : > { %1440 = vxpose.xlu1.b32.cont [15/16] %v1401_v52, 128 }
 0x6a1   : > { %1441 = vxpose.xlu1.b32.end [16/16] %v2345_v51, 128 }
 0x6e1   : > { %v1442_v55 = vpop.trf.xlu1 }
 0x6e2   : > { %v1458_v56 = vadd.f32 %v1442_v55, %v1410_v54 }
 0x6e4   : > { %1474 = vst [vmem:[#allocation3 + $0x28] sm:$0xff] %v1458_v56 }
 0x6e5   : > { %v1443_v58 = vpop.trf.xlu1 }
 0x6e6   : > { %v1459_v59 = vadd.f32 %v1443_v58, %v1411_v57 }
 0x6e8   : > { %1475 = vst [vmem:[#allocation3 + $0x68] sm:$0xff] %v1459_v59 }
 0x6e9   : > { %v1444_v61 = vpop.trf.xlu1 }
 0x6ea   : > { %v1460_v62 = vadd.f32 %v1444_v61, %v1412_v60 }
 0x6ec   : > { %1476 = vst [vmem:[#allocation3 + $0x10] sm:$0xff] %v1460_v62 }
 0x6ed   : > { %v1445_v39 = vpop.trf.xlu1 }
 0x6ee   : > { %v1461_v0 = vadd.f32 %v1445_v39, %v1413_v63 }
 0x6f0   : > { %1477 = vst [vmem:[#allocation3 + $0x40] sm:$0xff] %v1461_v0 }
 0x6f1   : > { %v1446_v2 = vpop.trf.xlu1 }
 0x6f2   : > { %v1462_v3 = vadd.f32 %v1446_v2, %v1414_v1 }
 0x6f4   : > { %1478 = vst [vmem:[#allocation3 + $0x48] sm:$0xff] %v1462_v3 }
 0x6f5   : > { %v1447_v5 = vpop.trf.xlu1 }
 0x6f6   : > { %v1463_v6 = vadd.f32 %v1447_v5, %v1415_v4 }
 0x6f8   : > { %1479 = vst [vmem:[#allocation3 + $0x30] sm:$0xff] %v1463_v6 }
 0x6f9   : > { %v1448_v8 = vpop.trf.xlu1 }
 0x6fa   : > { %v1464_v9 = vadd.f32 %v1448_v8, %v1416_v7 }
 0x6fc   : > { %1480 = vst [vmem:[#allocation3 + $0x70] sm:$0xff] %v1464_v9 }
 0x6fd   : > { %v1449_v11 = vpop.trf.xlu1 }
 0x6fe   : > { %v1465_v12 = vadd.f32 %v1449_v11, %v1417_v10 }
 0x700   : > { %1481 = vst [vmem:[#allocation3 + $0x38] sm:$0xff] %v1465_v12 }
 0x701   : > { %v1450_v14 = vpop.trf.xlu1 }
 0x702   : > { %v1466_v15 = vadd.f32 %v1450_v14, %v1418_v13 }
 0x704   : > { %1482 = vst [vmem:[#allocation3 + $0x20] sm:$0xff] %v1466_v15 }
 0x705   : > { %v1451_v17 = vpop.trf.xlu1 }
 0x706   : > { %v1467_v18 = vadd.f32 %v1451_v17, %v1419_v16 }
 0x708   : > { %1483 = vst [vmem:[#allocation3 + $0x78] sm:$0xff] %v1467_v18 }
 0x709   : > { %v1452_v20 = vpop.trf.xlu1 }
 0x70a   : > { %v1468_v21 = vadd.f32 %v1452_v20, %v1420_v19 }
 0x70c   : > { %1484 = vst [vmem:[#allocation3 + $0x18] sm:$0xff] %v1468_v21 }
 0x70d   : > { %v1453_v23 = vpop.trf.xlu1 }
 0x70e   : > { %v1469_v24 = vadd.f32 %v1453_v23, %v1421_v22 }
 0x710   : > { %1485 = vst [vmem:[#allocation3 + $0x58] sm:$0xff] %v1469_v24 }
 0x711   : > { %v1454_v26 = vpop.trf.xlu1 }
 0x712   : > { %v1470_v27 = vadd.f32 %v1454_v26, %v1422_v25 }
 0x714   : > { %1486 = vst [vmem:[#allocation3] sm:$0xff] %v1470_v27 }
 0x715   : > { %v1455_v29 = vpop.trf.xlu1 }
 0x716   : > { %v1471_v30 = vadd.f32 %v1455_v29, %v1423_v28 }
 0x718   : > { %1487 = vst [vmem:[#allocation3 + $0x8] sm:$0xff] %v1471_v30 }
 0x719   : > { %v1456_v32 = vpop.trf.xlu1 }
 0x71a   : > { %v1472_v33 = vadd.f32 %v1456_v32, %v1424_v31 }
 0x71c   : > { %1488 = vst [vmem:[#allocation3 + $0x60] sm:$0xff] %v1472_v33 }
 0x71d   : > { %v1457_v35 = vpop.trf.xlu1 }
 0x71e   : > { %v1473_v36 = vadd.f32 %v1457_v35, %v1425_v34 }
 0x720   : > { %1489 = vst [vmem:[#allocation3 + $0x50] sm:$0xff] %v1473_v36 }
 0x721 PF: > { %p1865_p11 = scmp.ne.s32.totalorder %s2781_s25, 2 }
 0x723   : > { %1509 = sbr.rel (%p1865_p11) target bundleno = 2074 (0x81a), region = 76 }
 0x728   : > { %v1541_v37 = vld [vmem:[#allocation3 + $0x50] sm:$0xff]  ;;  %v1540_v38 = vld [vmem:[#allocation3 + $0x60] sm:$0xff]  ;;  %v1539_v40 = vld [vmem:[#allocation3 + $0x8] sm:$0xff] }
 0x729   : > { %2346 = vmatprep.subr.mxu0 %v1541_v37  ;;  %2434 = vmatprep.subr.mxu1 %v1541_v37  ;;  %v1538_v41 = vld [vmem:[#allocation3] sm:$0xff]  ;;  %v1537_v42 = vld [vmem:[#allocation3 + $0x58] sm:$0xff]  ;;  %v1532_v47 = vld [vmem:[#allocation3 + $0x70] sm:$0xff] }
 0x72a   : > { %2347 = vmatpush3.msra.mxu0 %v1541_v37  ;;  %2450 = vmatpush3.msra.mxu1 %v1541_v37  ;;  %v1536_v43 = vld [vmem:[#allocation3 + $0x18] sm:$0xff]  ;;  %v1534_v45 = vld [vmem:[#allocation3 + $0x20] sm:$0xff]  ;;  %v1531_v48 = vld [vmem:[#allocation3 + $0x30] sm:$0xff] }
 0x72b   : > { %2348 = vmatprep.subr.mxu0 %v1540_v38  ;;  %2435 = vmatprep.subr.mxu1 %v1540_v38  ;;  %v1535_v44 = vld [vmem:[#allocation3 + $0x78] sm:$0xff]  ;;  %v1530_v49 = vld [vmem:[#allocation3 + $0x48] sm:$0xff]  ;;  %v1529_v50 = vld [vmem:[#allocation3 + $0x40] sm:$0xff] }
 0x72c   : > { %2349 = vmatpush3.msra.mxu0 %v1540_v38  ;;  %2451 = vmatpush3.msra.mxu1 %v1540_v38  ;;  %v1533_v46 = vld [vmem:[#allocation3 + $0x38] sm:$0xff]  ;;  %v1528_v51 = vld [vmem:[#allocation3 + $0x10] sm:$0xff]  ;;  %v1527_v52 = vld [vmem:[#allocation3 + $0x68] sm:$0xff] }
 0x72d   : > { %2350 = vmatprep.subr.mxu0 %v1539_v40  ;;  %2436 = vmatprep.subr.mxu1 %v1539_v40  ;;  %v1526_v53 = vld [vmem:[#allocation3 + $0x28] sm:$0xff]  ;;  %v1510_v54 = vld [vmem:[%s3008_s26] sm:$0xff]  ;;  %v1512_v58 = vld [vmem:[%s3008_s26 + $0x10] sm:$0xff] }
 0x72e   : > { %2351 = vmatpush3.msra.mxu0 %v1539_v40  ;;  %2452 = vmatpush3.msra.mxu1 %v1539_v40  ;;  %v1518_v55 = vld [vmem:[%s3008_s26 + $0x40] sm:$0xff]  ;;  %v1511_v56 = vld [vmem:[%s3008_s26 + $0x8] sm:$0xff]  ;;  %v1520_v59 = vld [vmem:[%s3008_s26 + $0x50] sm:$0xff] }
 0x72f   : > { %2352 = vmatprep.subr.mxu0 %v1538_v41  ;;  %2437 = vmatprep.subr.mxu1 %v1538_v41  ;;  %v1519_v57 = vld [vmem:[%s3008_s26 + $0x48] sm:$0xff]  ;;  %v1513_v60 = vld [vmem:[%s3008_s26 + $0x18] sm:$0xff]  ;;  %v1514_v62 = vld [vmem:[%s3008_s26 + $0x20] sm:$0xff] }
 0x730   : > { %2353 = vmatpush3.msra.mxu0 %v1538_v41  ;;  %2453 = vmatpush3.msra.mxu1 %v1538_v41  ;;  %v1521_v61 = vld [vmem:[%s3008_s26 + $0x58] sm:$0xff]  ;;  %v1522_v63 = vld [vmem:[%s3008_s26 + $0x60] sm:$0xff]  ;;  %v1515_v39 = vld [vmem:[%s3008_s26 + $0x28] sm:$0xff] }
 0x731   : > { %2354 = vmatprep.subr.mxu0 %v1537_v42  ;;  %2438 = vmatprep.subr.mxu1 %v1537_v42  ;;  %v1523_v0 = vld [vmem:[%s3008_s26 + $0x68] sm:$0xff]  ;;  %v1516_v1 = vld [vmem:[%s3008_s26 + $0x30] sm:$0xff]  ;;  %v1517_v3 = vld [vmem:[%s3008_s26 + $0x38] sm:$0xff] }
 0x732   : > { %2355 = vmatpush3.msra.mxu0 %v1537_v42  ;;  %2454 = vmatpush3.msra.mxu1 %v1537_v42  ;;  %v1524_v2 = vld [vmem:[%s3008_s26 + $0x70] sm:$0xff]  ;;  %v1525_v4 = vld [vmem:[%s3008_s26 + $0x78] sm:$0xff] }
 0x733   : > { %2356 = vmatprep.subr.mxu0 %v1536_v43  ;;  %2439 = vmatprep.subr.mxu1 %v1536_v43 }
 0x734   : > { %2357 = vmatpush3.msra.mxu0 %v1536_v43  ;;  %2455 = vmatpush3.msra.mxu1 %v1536_v43 }
 0x735   : > { %2358 = vmatprep.subr.mxu0 %v1535_v44  ;;  %2440 = vmatprep.subr.mxu1 %v1535_v44 }
 0x736   : > { %2359 = vmatpush3.msra.mxu0 %v1535_v44  ;;  %2456 = vmatpush3.msra.mxu1 %v1535_v44 }
 0x737   : > { %2360 = vmatprep.subr.mxu0 %v1534_v45  ;;  %2441 = vmatprep.subr.mxu1 %v1534_v45 }
 0x738   : > { %2361 = vmatpush3.msra.mxu0 %v1534_v45  ;;  %2457 = vmatpush3.msra.mxu1 %v1534_v45 }
 0x739   : > { %2362 = vmatprep.subr.mxu0 %v1533_v46  ;;  %2442 = vmatprep.subr.mxu1 %v1533_v46 }
 0x73a   : > { %2363 = vmatpush3.msra.mxu0 %v1533_v46  ;;  %2458 = vmatpush3.msra.mxu1 %v1533_v46 }
 0x73b   : > { %2364 = vmatprep.subr.mxu0 %v1532_v47  ;;  %2443 = vmatprep.subr.mxu1 %v1532_v47 }
 0x73c   : > { %2365 = vmatpush3.msra.mxu0 %v1532_v47  ;;  %2459 = vmatpush3.msra.mxu1 %v1532_v47 }
 0x73d   : > { %2366 = vmatprep.subr.mxu0 %v1531_v48  ;;  %2444 = vmatprep.subr.mxu1 %v1531_v48 }
 0x73e   : > { %2367 = vmatpush3.msra.mxu0 %v1531_v48  ;;  %2460 = vmatpush3.msra.mxu1 %v1531_v48 }
 0x73f   : > { %2368 = vmatprep.subr.mxu0 %v1530_v49  ;;  %2445 = vmatprep.subr.mxu1 %v1530_v49 }
 0x740   : > { %2369 = vmatpush3.msra.mxu0 %v1530_v49  ;;  %2461 = vmatpush3.msra.mxu1 %v1530_v49 }
 0x741   : > { %2370 = vmatprep.subr.mxu0 %v1529_v50  ;;  %2446 = vmatprep.subr.mxu1 %v1529_v50 }
 0x742   : > { %2371 = vmatpush3.msra.mxu0 %v1529_v50  ;;  %2462 = vmatpush3.msra.mxu1 %v1529_v50 }
 0x743   : > { %2372 = vmatprep.subr.mxu0 %v1528_v51  ;;  %2447 = vmatprep.subr.mxu1 %v1528_v51 }
 0x744   : > { %2373 = vmatpush3.msra.mxu0 %v1528_v51  ;;  %2463 = vmatpush3.msra.mxu1 %v1528_v51 }
 0x745   : > { %2374 = vmatprep.subr.mxu0 %v1527_v52  ;;  %2448 = vmatprep.subr.mxu1 %v1527_v52 }
 0x746   : > { %2375 = vmatpush3.msra.mxu0 %v1527_v52  ;;  %2464 = vmatpush3.msra.mxu1 %v1527_v52 }
 0x747   : > { %2376 = vmatprep.subr.mxu0 %v1526_v53  ;;  %2449 = vmatprep.subr.mxu1 %v1526_v53 }
 0x748   : > { %2377 = vmatpush3.msra.mxu0 %v1526_v53  ;;  %2465 = vmatpush3.msra.mxu1 %v1526_v53 }
 0x749   : > { %2378 = vmatprep.mubr.f32.mxu0 %v1510_v54  ;;  %2390 = vmatprep.mubr.f32.mxu1 %v1518_v55 }
 0x74a   : > { %2379 = vmatmul.mubr.f32.vlgmr.msra.gmra.mxu0 %v1511_v56  ;;  %2391 = vmatmul.mubr.f32.vlgmr.msra.gmra.mxu1 %v1519_v57 }
 0x74b   : > { %2381 = vmatprep.mubr.f32.mxu0 %v1512_v58  ;;  %2393 = vmatprep.mubr.f32.mxu1 %v1520_v59 }
 0x74e   : > { %2382 = vmatmul.mubr.f32.gmra.mxu0 %v1513_v60  ;;  %2394 = vmatmul.mubr.f32.gmra.mxu1 %v1521_v61 }
 0x74f   : > { %2384 = vmatprep.mubr.f32.mxu0 %v1514_v62  ;;  %2396 = vmatprep.mubr.f32.mxu1 %v1522_v63 }
 0x752   : > { %2385 = vmatmul.mubr.f32.gmra.mxu0 %v1515_v39  ;;  %2397 = vmatmul.mubr.f32.gmra.mxu1 %v1523_v0 }
 0x753   : > { %2387 = vmatprep.mubr.f32.mxu0 %v1516_v1  ;;  %2399 = vmatprep.mubr.f32.mxu1 %v1524_v2 }
 0x756   : > { %2388 = vmatmul.mubr.f32.gmra.mxu0 %v1517_v3  ;;  %2400 = vmatmul.mubr.f32.gmra.mxu1 %v1525_v4 }
 0x80a   : > { %v2380_v5 = vpop.f32.mrf.mxu0  ;;  %v2392_v6 = vpop.f32.mrf.mxu1 }
 0x80b   : > { %1688 = vst [vmem:[%s3031_s10 + $0x8] sm:$0xff] %v2380_v5  ;;  %1696 = vst [vmem:[%s3031_s10 + $0x48] sm:$0xff] %v2392_v6 }
 0x80c   : > { %v1608_v7 = vpop.f32.mrf.mxu0  ;;  %v1648_v8 = vpop.f32.mrf.mxu1 }
 0x80d   : > { %1687 = vst [vmem:[%s3031_s10] sm:$0xff] %v1608_v7  ;;  %1695 = vst [vmem:[%s3031_s10 + $0x40] sm:$0xff] %v1648_v8 }
 0x80e   : > { %v2383_v9 = vpop.f32.mrf.mxu0  ;;  %v2395_v10 = vpop.f32.mrf.mxu1 }
 0x80f   : > { %1690 = vst [vmem:[%s3031_s10 + $0x18] sm:$0xff] %v2383_v9  ;;  %1698 = vst [vmem:[%s3031_s10 + $0x58] sm:$0xff] %v2395_v10 }
 0x810   : > { %v1618_v11 = vpop.f32.mrf.mxu0  ;;  %v1658_v12 = vpop.f32.mrf.mxu1 }
 0x811   : > { %1689 = vst [vmem:[%s3031_s10 + $0x10] sm:$0xff] %v1618_v11  ;;  %1697 = vst [vmem:[%s3031_s10 + $0x50] sm:$0xff] %v1658_v12 }
 0x812   : > { %v2386_v13 = vpop.f32.mrf.mxu0  ;;  %v2398_v14 = vpop.f32.mrf.mxu1 }
 0x813   : > { %1692 = vst [vmem:[%s3031_s10 + $0x28] sm:$0xff] %v2386_v13  ;;  %1700 = vst [vmem:[%s3031_s10 + $0x68] sm:$0xff] %v2398_v14 }
 0x814   : > { %v1628_v15 = vpop.f32.mrf.mxu0  ;;  %v1668_v16 = vpop.f32.mrf.mxu1 }
 0x815   : > { %1691 = vst [vmem:[%s3031_s10 + $0x20] sm:$0xff] %v1628_v15  ;;  %1699 = vst [vmem:[%s3031_s10 + $0x60] sm:$0xff] %v1668_v16 }
 0x816   : > { %v2389_v17 = vpop.f32.mrf.mxu0  ;;  %v2401_v18 = vpop.f32.mrf.mxu1 }
 0x817   : > { %1694 = vst [vmem:[%s3031_s10 + $0x38] sm:$0xff] %v2389_v17  ;;  %1702 = vst [vmem:[%s3031_s10 + $0x78] sm:$0xff] %v2401_v18 }
 0x818   : > { %v1638_v19 = vpop.f32.mrf.mxu0  ;;  %v1678_v20 = vpop.f32.mrf.mxu1 }
 0x819   : > { %1693 = vst [vmem:[%s3031_s10 + $0x30] sm:$0xff] %v1638_v19  ;;  %1701 = vst [vmem:[%s3031_s10 + $0x70] sm:$0xff] %v1678_v20 }
 0x81a PF: > { %s1873_s25 = sshll.u32 %s2777_s24, 11  ;;  %s1717_s4 = sshll.u32 %s3031_s10, 4  ;;  %s3273_s4 = int_to_ptr.vmem [resolvable:$true] %s1717_s4 }
 0x81b   : > { %s3270_s13 = scalar_lea.hbm %s3332_s6, %s1873_s25  ;;  %s1704_s16 = scalar_lea.sflag [#allocation6], %s3004_s0 }
 0x81c   : > { %s2685_s17 = scalar_lea.vmem %s3273_s4, 2048  ;;  %s2804_s18 = smov [#allocation12]  }
 0x81d   : > { %p2686_p12 = scmp.ne.s32.totalorder %s3273_s4, %s2685_s17  ;;  %s2689_s1 = sshll.u32 %s2804_s18, 4  ;;  %s2690_s1 = int_to_ptr.vmem [resolvable:$false] %s2689_s1 }
 0x81e   : > { %s2691_s24 = scalar_lea.vmem %s2690_s1, 4096  ;;  %p2692_p10 = scmp.lt.s32.totalorder %s3273_s4, %s2690_s1 }
 0x81f   : > { %p2687_p13 = pnand %p2686_p12, %p2955_p5  ;;  %p2693_p0 = scmp.lt.s32.totalorder %s2691_s24, %s2685_s17 }
 0x821   : > { %p2688_p3 = pneg %p2687_p13  ;;  %p2694_p7 = por %p2693_p0, %p2692_p10 }
 0x823   : > { %p2695_p8 = pnand %p2694_p7, %p2688_p3 }
 0x825   : > { %2698 = shalt.err (!%p2695_p8)
}
 0x826   : > { %s2699_s2 = scalar_lea.hbm %s3270_s13, 2048  ;;  %s2703_s9 = scalar_lea.hbm %s3332_s6, 4096 }
 0x827   : > { %p2700_p9 = scmp.ne.s32.totalorder %s3270_s13, %s2699_s2  ;;  %p2704_p4 = scmp.lt.s32.totalorder %s3270_s13, %s3332_s6 }
 0x828   : > { %p2705_p11 = scmp.lt.s32.totalorder %s2703_s9, %s2699_s2 }
 0x829   : > { %p2701_p2 = pnand %p2700_p9, %p2955_p5 }
 0x82a   : > { %p2706_p12 = por %p2705_p11, %p2704_p4 }
 0x82b   : > { %p2702_p1 = pneg %p2701_p2 }
 0x82d   : > { %p2707_p13 = pnand %p2706_p12, %p2702_p1 }
 0x82f   : > { %2710 = shalt.err (!%p2707_p13)
}
 0x830   : > { %s2805_s29 = smov 128   ;;  %s2806_s7 = smov 8  }
 0x831   : > { %2478 = dma.vmem_to_hbm [thread:$0]  (%p2955_p5), %s3273_s4, 2048, %s3270_s13, %s1704_s16, %s2805_s29, %s2805_s29, %s2806_s7  }
 0x832 PF: > { %p2503_p3 = scmp.ge.s32.totalorder %s2793_s28, 2  ;;  %s1732_s15 = sand.u32 1, %s2765_s21  }
 0x833   : > { %s1733_s12 = scalar_lea.sflag [#allocation6], %s1732_s15 }
 0x834   : > { %p2495_p10 = pnand %p2503_p3, %p2897_p6 }
 0x836   : > { %p2496_p0 = pneg %p2495_p10 }
 0x838   : > { %2760 = dma.done.wait (%p2496_p0), %s1733_s12, 2048  }
 0x839   : > { %2762 = vsyncadd (%p2496_p0), %s1733_s12, 4294965248  ;;  %s26_s28 = sadd.s32 1, %s2793_s28   ;;  %s3361_s24 = sld [smem:[#allocation18_spill]] }
 0x83a   : > { %p23_p7 = scmp.ge.s32.totalorder %s26_s28, 8   ;;  %s3362_s25 = sld [smem:[#allocation19_spill]] }
 0x83b   : > { %s3363_s26 = sld [smem:[#allocation20_spill]]  ;;  %s3365_s21 = smov %s2769_s22 }
 0x83c   : > { %s3364_s27 = sld [smem:[#allocation21_spill]]  ;;  %s3366_s22 = smov %s2773_s23 }
 0x83d   : > { %s3367_s23 = smov %s2963_s19  ;;  %25 = sbr.rel (!%p23_p7) target bundleno = 15 (0xf), region = 126 }
 0x842   :  { %1738 = vsyncpa [#allocation5], 1 }
 0x843   :  { %1740 = vsyncpa [#allocation5 + $0x1], 1 }
 0x844   :  { %1741 = vsyncpa [#allocation8], 1 }
 0x845   :  { %1743 = vsyncpa [#allocation8 + $0x1], 1 }
 0x846   :  { %1744 = vsyncpa [#allocation11], 1 }
 0x847   :  { %1745 = vsyncpa [#allocation6], 1 }
 0x848   :  { %1747 = vsyncpa [#allocation6 + $0x1], 1 }

</bundles_post_ra>
